<compile_context>
chip_gen: v7x
topology: tpu7x:2x2x1
jax: 0.10.0
libtpu: 0.0.40
codegen_flags: <defaults>
</compile_context>

<pallas_src>
import functools

import jax
import jax.numpy as jnp
import numpy as np
from jax import lax
from jax.experimental import pallas as pl
from jax.experimental.pallas import tpu as pltpu

EPS = 1e-6
_FLAT_RI_MAX_C = 16      # up to this many channels, Ri is built flat (tn, C*C)


def _round_up(x, m):
    return ((x + m - 1) // m) * m


def _cdiv(a, b):
    return -(-a // b)


def _rlsa_kernel(x_ref, w_ref, b_ref, rs_ref, ri_ref, *, eps, channels, flat_ri):
    C = channels
    x_cm = x_ref[0]                                   # (C, tn) channel-major

    # Fused QKV projection.  The NCHW tile is channel-major; contracting its
    # channel (sublane) axis on the MXU absorbs the tokens-major transpose.
    qkv = lax.dot_general(
        x_cm, w_ref[...],
        dimension_numbers=(((0,), (0,)), ((), ())),
        preferred_element_type=jnp.float32,
    ) + b_ref[...]                                    # (tn, 3C) token-major
    q = qkv[:, :C]
    k = qkv[:, C:2 * C]
    v = qkv[:, 2 * C:]

    # elu(x) + 1  ==  x + 1 (x > 0) ;  exp(x) (x <= 0)
    Q = jnp.where(q > 0, q + 1.0, jnp.exp(q))         # (tn, C)
    K = jnp.where(k > 0, k + 1.0, jnp.exp(k))         # (tn, C)

    # state = None  =>  Si = K, Ri = K (x) v, and
    #   RLSA = einsum('nc,ncm,n->nm', Q, K(x)v, 1/(Q.K+eps)) = (Q.K)/(Q.K+eps)*v
    s = jnp.sum(Q * K, axis=-1, keepdims=True)        # (tn, 1)
    rlsa = (s / (s + eps)) * v                        # (tn, C)

    # RLSA and Si fused into one output slab: one store/DMA stream, not two.
    rs_ref[0] = jnp.concatenate([rlsa, K], axis=-1).astype(rs_ref.dtype)

    if flat_ri:
        # Build Ri directly in its flat (tn, C*C) store layout: lane block c
        # holds K[:, c] * v.  No (tn, C, C) broadcast intermediate and no
        # reshape/relayout VMEM copy.
        parts = [K[:, c:c + 1] * v for c in range(C)]
        ri_ref[0] = jnp.concatenate(parts, axis=-1).astype(ri_ref.dtype)
    else:
        # Large C: store the outer product straight into a (1, tn, C, C) block
        # (lane-dense when C % 128 == 0); still no reshape.
        ri_ref[0] = (K[:, :, None] * v[:, None, :]).astype(ri_ref.dtype)


def _vmem_capacity_bytes():
    """Physical VMEM for this generation (128 MiB v5e/v6e, 64 MiB v7x)."""
    try:
        cap = getattr(pltpu.get_tpu_info(), "vmem_capacity_bytes", None)
        if cap:
            return int(cap)
    except Exception:
        pass
    return 64 << 20        # conservative (v7x-sized) default


def _block_bytes_per_token(C, state_bytes):
    # Double-buffered in/out blocks plus in-kernel temporaries, per token.
    ri_out = 2 * C * C * state_bytes        # Ri output block (double-buffered)
    rs_out = 2 * 2 * C * 4                  # RLSA|Si output block
    x_in = 2 * C * 4                        # channel-major input block
    tmp = (2 * C * C + 12 * C) * 4          # qkv / Q / K / v / concat temps
    return ri_out + rs_out + x_in + tmp


def _pick_tile_n(B, N, C, budget_bytes, state_bytes, tile_n=None):
    """Token-tile size: a multiple of 128 (tokens ride the lane axis of the
    NCHW input block), derived from the VMEM budget, then capped so the grid
    has >= ~4 total steps (>= 2 per TensorCore under megacore partitioning)."""
    n_ceil = _round_up(max(N, 1), 128)
    per_token = max(1, _block_bytes_per_token(C, state_bytes))
    if tile_n is None:
        tile_n = (budget_bytes // per_token) // 128 * 128
    tile_n = max(128, (int(tile_n) // 128) * 128)
    tile_n = min(tile_n, n_ceil)
    min_total_steps = 4
    steps_per_batch = max(1, _cdiv(min_total_steps, max(B, 1)))
    tile_n = min(tile_n, _round_up(_cdiv(N, steps_per_batch), 128))
    return max(128, tile_n)


def recurrent_linear_self_attention(feature, params, *, eps=EPS, tile_n=None,
                                    state_dtype=jnp.float32):
    """feature: (B, C, H, W) float32 NCHW, like the PyTorch module input.

    Implements the state=None forward. Returns (RLSA, (Ri, Si)) with
    RLSA: (B, N, C) float32; Ri: (B, N, C, C) and Si: (B, N, C) in
    `state_dtype` (default float32; bfloat16 halves the dominant Ri writeback
    if downstream tolerates it).
    """
    # TODO(synk): the state != None path (incoming Ri/Si accumulators) is not
    # implemented; it would add the previous state tensors as extra inputs.
    B, C, H, W = feature.shape
    N = H * W
    flat_ri = C <= _FLAT_RI_MAX_C
    state_bytes = jnp.dtype(state_dtype).itemsize

    # Generation-aware VMEM budget: big tiles on 128 MiB parts (v5e/v6e),
    # conservative on v7x (64 MiB physical, 3.2 TB/s HBM).
    vmem_cap = _vmem_capacity_bytes()
    big_vmem = vmem_cap >= (100 << 20)
    budget = (56 << 20) if big_vmem else (26 << 20)
    vmem_limit = (96 << 20) if big_vmem else (44 << 20)

    tn = _pick_tile_n(B, N, C, budget, state_bytes, tile_n)
    n_pad = _round_up(N, tn)

    est_block = _block_bytes_per_token(C, state_bytes) * tn
    if est_block > vmem_limit:
        vmem_limit = min(int(vmem_cap * 0.85),
                         _round_up(est_block + (8 << 20), 1 << 20))
    if est_block > vmem_limit:
        # TODO(synk): very large channel counts need tiling over the C*C state
        # dimension; not implemented here.
        raise ValueError(
            f"channels={C}: one token tile needs ~{est_block >> 20} MiB of "
            "VMEM, which does not fit; tile over the C*C dimension.")

    # NCHW -> (B, C, N) is a contiguous (free) reshape; no wrapper transpose,
    # the tokens-major layout is produced inside the kernel's projection.
    x = feature.reshape(B, C, N).astype(jnp.float32)
    if n_pad != N:
        x = jnp.pad(x, ((0, 0), (0, 0), (0, n_pad - N)))
    grid = (B, n_pad // tn)

    # Fused projection weights: qkv = tokens @ W_qkv + b_qkv, with
    # W_qkv = [W_q^T | W_k^T | W_v^T] of shape (C, 3C).
    w_qkv = jnp.concatenate(
        [params["w_q"].T, params["w_k"].T, params["w_v"].T], axis=1
    ).astype(jnp.float32)
    b_qkv = jnp.concatenate(
        [params["b_q"], params["b_k"], params["b_v"]]
    ).reshape(1, 3 * C).astype(jnp.float32)

    x_spec = pl.BlockSpec((1, C, tn), lambda b, i: (b, 0, i))
    w_spec = pl.BlockSpec((C, 3 * C), lambda b, i: (0, 0))
    b_spec = pl.BlockSpec((1, 3 * C), lambda b, i: (0, 0))
    rs_spec = pl.BlockSpec((1, tn, 2 * C), lambda b, i: (b, i, 0))
    if flat_ri:
        ri_spec = pl.BlockSpec((1, tn, C * C), lambda b, i: (b, i, 0))
        ri_shape = jax.ShapeDtypeStruct((B, n_pad, C * C), state_dtype)
    else:
        ri_spec = pl.BlockSpec((1, tn, C, C), lambda b, i: (b, i, 0, 0))
        ri_shape = jax.ShapeDtypeStruct((B, n_pad, C, C), state_dtype)

    out_shapes = (
        jax.ShapeDtypeStruct((B, n_pad, 2 * C), jnp.float32),   # RLSA | Si
        ri_shape,                                               # Ri
    )

    kernel = functools.partial(_rlsa_kernel, eps=eps, channels=C,
                               flat_ri=flat_ri)

    rs, ri_out = pl.pallas_call(
        kernel,
        out_shape=out_shapes,
        grid_spec=pltpu.PrefetchScalarGridSpec(
            num_scalar_prefetch=0,
            grid=grid,
            in_specs=[x_spec, w_spec, b_spec],
            out_specs=[rs_spec, ri_spec],
        ),
        compiler_params=pltpu.CompilerParams(
            dimension_semantics=("parallel", "parallel"),
            vmem_limit_bytes=int(vmem_limit)),
    )(x, w_qkv, b_qkv)

    rlsa = rs[:, :N, :C]
    si = rs[:, :N, C:].astype(state_dtype)
    if flat_ri:
        ri = ri_out[:, :N, :].reshape(B, N, C, C)
    else:
        ri = ri_out[:, :N]
    return rlsa, (ri, si)


def _reference(feature, params, eps=EPS):
    """Pure-JAX reference matching the PyTorch forward (state=None)."""
    B, C, H, W = feature.shape
    x = jnp.transpose(feature.reshape(B, C, H * W), (0, 2, 1))
    q = x @ params["w_q"].T + params["b_q"]
    k = x @ params["w_k"].T + params["b_k"]
    v = x @ params["w_v"].T + params["b_v"]
    Q = jax.nn.elu(q) + 1.0
    K = jax.nn.elu(k) + 1.0
    Si = K
    Ri = jnp.einsum("bnc,bnm->bncm", K, v)
    Z = 1.0 / (jnp.einsum("bnc,bnc->bn", Q, Si) + eps)
    rlsa = jnp.einsum("bnc,bncm,bn->bnm", Q, Ri, Z)
    return rlsa, (Ri, Si)


def _init_params(key, channels):
    """Deterministic init mimicking nn.Linear default (uniform +-1/sqrt(fan_in))."""
    bound = 1.0 / np.sqrt(channels)
    keys = jax.random.split(key, 6)
    u = lambda k, shp: jax.random.uniform(k, shp, jnp.float32, -bound, bound)
    return {
        "w_q": u(keys[0], (channels, channels)), "b_q": u(keys[1], (channels,)),
        "w_k": u(keys[2], (channels, channels)), "b_k": u(keys[3], (channels,)),
        "w_v": u(keys[4], (channels, channels)), "b_v": u(keys[5], (channels,)),
    }


if __name__ == "__main__":
    B, C, H, W = 2, 4, 16, 16
    key = jax.random.PRNGKey(0)
    k_feat, k_param = jax.random.split(key)
    feature = jax.random.normal(k_feat, (B, C, H, W), jnp.float32)
    params = _init_params(k_param, C)

    rlsa, (ri, si) = recurrent_linear_self_attention(feature, params)
    jax.block_until_ready((rlsa, ri, si))

    rlsa_ref, (ri_ref, si_ref) = _reference(feature, params)
    np.testing.assert_allclose(np.asarray(rlsa), np.asarray(rlsa_ref),
                               rtol=1e-5, atol=1e-5)
    np.testing.assert_allclose(np.asarray(ri), np.asarray(ri_ref),
                               rtol=1e-5, atol=1e-5)
    np.testing.assert_allclose(np.asarray(si), np.asarray(si_ref),
                               rtol=1e-5, atol=1e-5)
    print("KERNEL_OK")
</pallas_src>

<mosaic_0001>
module attributes {stable_mosaic.version = 11 : i64} {
  func.func @_rlsa_kernel(%arg0: i32, %arg1: i32, %arg2: memref<1x4x128xf32, #tpu.memory_space<vmem>>, %arg3: memref<4x12xf32, #tpu.memory_space<vmem>>, %arg4: memref<1x12xf32, #tpu.memory_space<vmem>>, %arg5: memref<1x128x8xf32, #tpu.memory_space<vmem>>, %arg6: memref<1x128x16xf32, #tpu.memory_space<vmem>>) attributes {dimension_semantics = [#tpu.dimension_semantics<parallel>, #tpu.dimension_semantics<parallel>], iteration_bounds = array<i64: 2, 2>, scalar_prefetch = 0 : i64, scratch_operands = 0 : i64, tpu.core_type = #tpu.core_type<tc>, window_params = [{transform_indices = @transform_0, window_bounds = array<i64: 1, 4, 128>}, {pipeline_mode = #tpu.pipeline_mode<synchronous>, transform_indices = @transform_1, window_bounds = array<i64: 4, 12>}, {pipeline_mode = #tpu.pipeline_mode<synchronous>, transform_indices = @transform_2, window_bounds = array<i64: 1, 12>}, {transform_indices = @transform_3, window_bounds = array<i64: 1, 128, 8>}, {transform_indices = @transform_4, window_bounds = array<i64: 1, 128, 16>}]} {
    %c0 = arith.constant 0 : index
    %c0_0 = arith.constant 0 : index
    %c0_1 = arith.constant 0 : index
    %0 = vector.load %arg2[%c0, %c0_0, %c0_1] : memref<1x4x128xf32, #tpu.memory_space<vmem>>, vector<1x4x128xf32>
    %1 = vector.shape_cast %0 : vector<1x4x128xf32> to vector<4x128xf32>
    %c0_2 = arith.constant 0 : index
    %c0_3 = arith.constant 0 : index
    %2 = vector.load %arg3[%c0_2, %c0_3] : memref<4x12xf32, #tpu.memory_space<vmem>>, vector<4x12xf32>
    %cst = arith.constant dense<0.000000e+00> : vector<128x12xf32>
    %3 = tpu.matmul %1, %2, %cst {dimension_numbers = #tpu.dot_dimension_numbers<[0], [0], [1], [1], [0, 1, 1, 1], [], []>} : vector<4x128xf32>, vector<4x12xf32>, vector<128x12xf32> -> vector<128x12xf32>
    %c0_4 = arith.constant 0 : index
    %c0_5 = arith.constant 0 : index
    %4 = vector.load %arg4[%c0_4, %c0_5] : memref<1x12xf32, #tpu.memory_space<vmem>>, vector<1x12xf32>
    %5 = vector.broadcast %4 : vector<1x12xf32> to vector<128x12xf32>
    %6 = arith.addf %3, %5 : vector<128x12xf32>
    %7 = vector.extract_strided_slice %6 {offsets = [0, 0], sizes = [128, 4], strides = [1, 1]} : vector<128x12xf32> to vector<128x4xf32>
    %8 = vector.extract_strided_slice %6 {offsets = [0, 4], sizes = [128, 4], strides = [1, 1]} : vector<128x12xf32> to vector<128x4xf32>
    %9 = vector.extract_strided_slice %6 {offsets = [0, 8], sizes = [128, 4], strides = [1, 1]} : vector<128x12xf32> to vector<128x4xf32>
    %cst_6 = arith.constant 0.000000e+00 : f32
    %10 = vector.broadcast %cst_6 : f32 to vector<128x4xf32>
    %11 = arith.cmpf ogt, %7, %10 : vector<128x4xf32>
    %cst_7 = arith.constant 1.000000e+00 : f32
    %12 = vector.broadcast %cst_7 : f32 to vector<128x4xf32>
    %13 = arith.addf %7, %12 : vector<128x4xf32>
    %14 = math.exp %7 : vector<128x4xf32>
    %15 = arith.select %11, %13, %14 : vector<128x4xi1>, vector<128x4xf32>
    %cst_8 = arith.constant 0.000000e+00 : f32
    %16 = vector.broadcast %cst_8 : f32 to vector<128x4xf32>
    %17 = arith.cmpf ogt, %8, %16 : vector<128x4xf32>
    %cst_9 = arith.constant 1.000000e+00 : f32
    %18 = vector.broadcast %cst_9 : f32 to vector<128x4xf32>
    %19 = arith.addf %8, %18 : vector<128x4xf32>
    %20 = math.exp %8 : vector<128x4xf32>
    %21 = arith.select %17, %19, %20 : vector<128x4xi1>, vector<128x4xf32>
    %22 = arith.mulf %15, %21 : vector<128x4xf32>
    %cst_10 = arith.constant dense<0.000000e+00> : vector<128xf32>
    %23 = vector.multi_reduction <add>, %22, %cst_10 [1] : vector<128x4xf32> to vector<128xf32>
    %24 = vector.shape_cast %23 : vector<128xf32> to vector<128x1xf32>
    %cst_11 = arith.constant 9.99999997E-7 : f32
    %25 = vector.broadcast %cst_11 : f32 to vector<128x1xf32>
    %26 = arith.addf %24, %25 : vector<128x1xf32>
    %27 = arith.divf %24, %26 : vector<128x1xf32>
    %28 = vector.broadcast %27 : vector<128x1xf32> to vector<128x4xf32>
    %29 = arith.mulf %28, %9 : vector<128x4xf32>
    %30 = tpu.concatenate %29, %21 in 1 : vector<128x4xf32>, vector<128x4xf32> -> vector<128x8xf32>
    %c0_12 = arith.constant 0 : index
    %c0_13 = arith.constant 0 : index
    %c0_14 = arith.constant 0 : index
    %31 = vector.load %arg5[%c0_12, %c0_13, %c0_14] : memref<1x128x8xf32, #tpu.memory_space<vmem>>, vector<1x128x8xf32>
    %32 = vector.shape_cast %31 : vector<1x128x8xf32> to vector<128x8xf32>
    %33 = vector.shape_cast %30 : vector<128x8xf32> to vector<1x128x8xf32>
    tpu.vector_store %arg5[%c0_12, %c0_13, %c0_14], %33 {strides = array<i32>} : memref<1x128x8xf32, #tpu.memory_space<vmem>>, vector<1x128x8xf32>,
    %34 = vector.extract_strided_slice %21 {offsets = [0, 0], sizes = [128, 1], strides = [1, 1]} : vector<128x4xf32> to vector<128x1xf32>
    %35 = vector.broadcast %34 : vector<128x1xf32> to vector<128x4xf32>
    %36 = arith.mulf %35, %9 : vector<128x4xf32>
    %37 = vector.extract_strided_slice %21 {offsets = [0, 1], sizes = [128, 1], strides = [1, 1]} : vector<128x4xf32> to vector<128x1xf32>
    %38 = vector.broadcast %37 : vector<128x1xf32> to vector<128x4xf32>
    %39 = arith.mulf %38, %9 : vector<128x4xf32>
    %40 = vector.extract_strided_slice %21 {offsets = [0, 2], sizes = [128, 1], strides = [1, 1]} : vector<128x4xf32> to vector<128x1xf32>
    %41 = vector.broadcast %40 : vector<128x1xf32> to vector<128x4xf32>
    %42 = arith.mulf %41, %9 : vector<128x4xf32>
    %43 = vector.extract_strided_slice %21 {offsets = [0, 3], sizes = [128, 1], strides = [1, 1]} : vector<128x4xf32> to vector<128x1xf32>
    %44 = vector.broadcast %43 : vector<128x1xf32> to vector<128x4xf32>
    %45 = arith.mulf %44, %9 : vector<128x4xf32>
    %46 = tpu.concatenate %36, %39, %42, %45 in 1 : vector<128x4xf32>, vector<128x4xf32>, vector<128x4xf32>, vector<128x4xf32> -> vector<128x16xf32>
    %c0_15 = arith.constant 0 : index
    %c0_16 = arith.constant 0 : index
    %c0_17 = arith.constant 0 : index
    %47 = vector.load %arg6[%c0_15, %c0_16, %c0_17] : memref<1x128x16xf32, #tpu.memory_space<vmem>>, vector<1x128x16xf32>
    %48 = vector.shape_cast %47 : vector<1x128x16xf32> to vector<128x16xf32>
    %49 = vector.shape_cast %46 : vector<128x16xf32> to vector<1x128x16xf32>
    tpu.vector_store %arg6[%c0_15, %c0_16, %c0_17], %49 {strides = array<i32>} : memref<1x128x16xf32, #tpu.memory_space<vmem>>, vector<1x128x16xf32>,
    return
  }
  func.func @transform_0(%arg0: i32, %arg1: i32) -> (i32, i32, i32) {
    %c0_i32 = arith.constant 0 : i32
    %c0_i32_0 = arith.constant 0 : i32
    return %arg0, %c0_i32, %arg1 : i32, i32, i32
  }
  func.func @transform_1(%arg0: i32, %arg1: i32) -> (i32, i32) {
    %c0_i32 = arith.constant 0 : i32
    %c0_i32_0 = arith.constant 0 : i32
    %c0_i32_1 = arith.constant 0 : i32
    return %c0_i32, %c0_i32_0 : i32, i32
  }
  func.func @transform_2(%arg0: i32, %arg1: i32) -> (i32, i32) {
    %c0_i32 = arith.constant 0 : i32
    %c0_i32_0 = arith.constant 0 : i32
    %c0_i32_1 = arith.constant 0 : i32
    return %c0_i32, %c0_i32_0 : i32, i32
  }
  func.func @transform_3(%arg0: i32, %arg1: i32) -> (i32, i32, i32) {
    %c0_i32 = arith.constant 0 : i32
    %c0_i32_0 = arith.constant 0 : i32
    return %arg0, %arg1, %c0_i32 : i32, i32, i32
  }
  func.func @transform_4(%arg0: i32, %arg1: i32) -> (i32, i32, i32) {
    %c0_i32 = arith.constant 0 : i32
    %c0_i32_0 = arith.constant 0 : i32
    return %arg0, %arg1, %c0_i32 : i32, i32, i32
  }
}

</mosaic_0001>

<bundles_post_ra>
// kernel: tpu_custom_call.1
= control target key start
LH: loop header
LB: loop body
LE: loop exit
PB: predicated region body
PF: predicated region fallthrough
CT: control target
= control target key end

     0   :  { %s3151_s0 = inlined_call_operand.hbm [shape: f32[2,4,256], index: 0, kind: input, shape index: {}]   ;;  %s3152_s1 = inlined_call_operand.hbm [shape: f32[4,12], index: 1, kind: input, shape index: {}]   ;;  %s3153_s2 = inlined_call_operand.vmem [shape: f32[1,12], index: 2, kind: input, shape index: {}]   ;;  %s3154_s3 = inlined_call_operand.vmem [shape: f32[2,256,8], index: 3, kind: output, shape index: {0}]   ;;  %s3155_s4 = inlined_call_operand.vmem [shape: f32[2,256,16], index: 4, kind: output, shape index: {1}]  }
   0x1   :  { %3185 = sst [smem:[#allocation38_spill]] %s3152_s1 }
   0x2   :  { %10 = vsyncpa [#allocation3], 0 }
   0x3   :  { %12 = vsyncpa [#allocation3 + $0x1], 0 }
   0x4   :  { %13 = vsyncpa [#allocation5], 0  ;;  %s2086_s15 = smov 0   ;;  %s2088_s16 = smov 0  }
   0x5   :  { %s2090_s17 = smov 0   ;;  %s2092_s18 = smov 0  }
   0x6   :  { %s2094_s19 = smov 0   ;;  %s2096_s20 = smov 0  }
   0x7   :  { %s2098_s21 = smov 0   ;;  %s2100_s22 = smov 0  }
   0x8 LB: > { %s1622_s23 = sadd.s32 4294967295, %s2050_s22   ;;  %p53_p0 = scmp.ne.s32.totalorder %s2026_s16, %s2022_s15  ;;  %s2050_s22 = sphi %s2100_s22, %s19_s22   ;;  %s2046_s21 = sphi %s2098_s21, %s3265_s21   ;;  %s2042_s20 = sphi %s2096_s20, %s3264_s20   ;;  %s2038_s19 = sphi %s2094_s19, %s3263_s19   ;;  %s2034_s18 = sphi %s2092_s18, %s3262_s18   ;;  %s2030_s17 = sphi %s2090_s17, %s3261_s17   ;;  %s2026_s16 = sphi %s2088_s16, %s3260_s16   ;;  %s2022_s15 = sphi %s2086_s15, %s3259_s15  }
   0x9   : > { %p2126_p1 = scmp.eq.s32.totalorder %s1622_s23, 0  ;;  %p1624_p2 = scmp.ge.s32.totalorder %s2050_s22, 1 }
   0xa   : > { %p162_p3 = scmp.lt.s32.totalorder %s2050_s22, 5  ;;  %s2052_s27 = smov [#allocation4]  }
   0xb   : > { %s3186_s24 = scalar_select %p2126_p1, 1, 0 }
   0xc   : > { %p2134_p4 = por %p2126_p1, %p53_p0  ;;  %p2138_p5 = pnand %p1624_p2, %p162_p3 }
   0xd   : > { %s175_s28 = sshll.u32 %s2052_s27, 4  ;;  %s28_s30 = sadd.s32 1, %s2042_s20  ;;  %s176_s28 = int_to_ptr.vmem [resolvable:$true] %s175_s28 }
   0xe   : > { %s3187_s25 = scalar_select %p2134_p4, 1, 0 }
   0xf   : > { %s3188_s26 = scalar_select %p2138_p5, 1, 0 }
  0x10   : > { %p1710_p6 = pneg %p2138_p5  ;;  %s3190_s1 = sld [smem:[#allocation38_spill]] }
  0x12   : > { %p2146_p7 = pnand %p1710_p6, %p2126_p1 }
  0x14   : > { %p1924_p9 = pneg %p2146_p7 }
  0x16   : > { %s1922_s7 = scalar_lea.hbm %s3190_s1, 64 }
  0x17   : > { %p1923_p8 = scmp.ne.s32.totalorder %s3190_s1, %s1922_s7  ;;  %p1929_p12 = scmp.lt.u32.totalorder %s1922_s7, %s3190_s1 }
  0x19   : > { %p1925_p10 = pnand %p1924_p9, %p1923_p8 }
  0x1b   : > { %p1926_p11 = pneg %p1925_p10 }
  0x1d   : > { %p1931_p13 = pnand %p1929_p12, %p1926_p11 }
  0x1f   : > { %1934 = shalt.err (!%p1931_p13)
}
  0x20   : > { %s1935_s12 = scalar_lea.vmem %s176_s28, 64  ;;  %p1943_p6 = scmp.lt.s32.totalorder %s176_s28, %s176_s28 }
  0x21   : > { %p1936_p0 = scmp.ne.s32.totalorder %s176_s28, %s1935_s12  ;;  %p1944_p1 = scmp.lt.s32.totalorder %s1935_s12, %s1935_s12 }
  0x23   : > { %p1938_p2 = pnand %p1936_p0, %p1924_p9  ;;  %p1945_p4 = por %p1944_p1, %p1943_p6 }
  0x25   : > { %p1939_p3 = pneg %p1938_p2 }
  0x27   : > { %p1946_p5 = pnand %p1945_p4, %p1939_p3 }
  0x29   : > { %1949 = shalt.err (!%p1946_p5)
}
  0x2a   : > { %1713 = dma.hbm_to_vmem [thread:$0]  (!%p2146_p7), %s3190_s1, 64, %s176_s28, [#allocation5]  }
  0x2b   : > { %p29_p8 = scmp.ge.s32.totalorder %s28_s30, 2  ;;  %s31_s15 = sadd.s32 1, %s2046_s21 }
  0x2c   : > { %s40_s23 = sadd.s32 1, %s2030_s17  ;;  %p47_p1 = scmp.ne.s32.totalorder %s2030_s17, %s2026_s16 }
  0x2d   : > { %s3267_s30 = smov (%p29_p8, %s28_s30), 0  ;;  %s3269_s15 = smov (!%p29_p8, %s31_s15), %s2046_s21 }
  0x2e   : > { %3191 = sst [smem:[#allocation8_spill]] %s3267_s30  ;;  %p48_p4 = scmp.eq.s32.totalorder %s2050_s22, 0 }
  0x2f   : > { %p33_p5 = scmp.ge.s32.totalorder %s3269_s15, 2  ;;  %s36_s27 = ssub.s32 %s2042_s20, %s3267_s30 }
  0x30   : > { %p1719_p9 = scmp.lt.s32.totalorder %s2050_s22, 4  ;;  %s189_s29 = sand.u32 1, %s2030_s17  }
  0x31   : > { %s3271_s15 = smov (%p33_p5, %s3269_s15), 0  ;;  %p2181_p7 = por %p48_p4, %p47_p1 }
  0x32   : > { %s1627_s5 = sshll.u32 %s189_s29, 2  ;;  %s35_s6 = ssub.s32 %s2046_s21, %s3271_s15 }
  0x33   : > { %s37_s7 = sor.u32 %s36_s27, %s35_s6  ;;  %s1628_s8 = sshll.u32 %s2046_s21, 1 }
  0x34   : > { %p38_p10 = scmp.eq.s32.totalorder %s37_s7, 0  ;;  %s198_s9 = sadd.s32 %s2042_s20, %s1628_s8 }
  0x35   : > { %s1629_s10 = sshll.u32 %s198_s9, 6  ;;  %s193_s11 = scalar_lea.vmem [#allocation2], %s1627_s5 }
  0x36   : > { %s202_s12 = sshll.u32 %s193_s11, 4  ;;  %s2195_s30 = scalar_lea.hbm %s3151_s0, %s1629_s10  ;;  %s2197_s12 = int_to_ptr.vmem [resolvable:$true] %s202_s12 }
  0x37   : > { %s2190_s13 = scalar_select %p38_p10, %s2030_s17, %s40_s23  }
  0x38   : > { %p2203_p11 = pnand %p1719_p9, %p2181_p7  ;;  %s190_s23 = scalar_lea.sflag [#allocation3], %s189_s29 }
  0x39   : > { %s1950_s5 = scalar_lea.hbm %s2195_s30, 64  ;;  %s1955_s28 = scalar_lea.hbm %s3151_s0, 256 }
  0x3a   : > { %p1951_p12 = scmp.ne.s32.totalorder %s2195_s30, %s1950_s5  ;;  %p1952_p13 = pneg %p2203_p11 }
  0x3b   : > { %p1956_p3 = scmp.lt.u32.totalorder %s2195_s30, %s3151_s0  ;;  %p1957_p6 = scmp.lt.u32.totalorder %s1955_s28, %s1950_s5 }
  0x3c   : > { %p1953_p0 = pnand %p1952_p13, %p1951_p12  ;;  %p1959_p1 = scmp.lt.u32.totalorder %s1950_s5, %s2195_s30 }
  0x3d   : > { %p1958_p8 = por %p1957_p6, %p1956_p3 }
  0x3e   : > { %p1954_p2 = pneg %p1953_p0 }
  0x3f   : > { %p1960_p4 = por %p1959_p1, %p1958_p8 }
  0x41   : > { %p1961_p5 = pnand %p1960_p4, %p1954_p2 }
  0x43   : > { %1964 = shalt.err (!%p1961_p5)
}
  0x44   : > { %s1965_s29 = scalar_lea.vmem %s2197_s12, 64  ;;  %s2053_s9 = smov [#allocation2]  }
  0x45   : > { %p1966_p9 = scmp.ne.s32.totalorder %s2197_s12, %s1965_s29  ;;  %s1970_s10 = sshll.u32 %s2053_s9, 4  ;;  %s1971_s10 = int_to_ptr.vmem [resolvable:$false] %s1970_s10 }
  0x46   : > { %s1972_s11 = scalar_lea.vmem %s1971_s10, 128  ;;  %p1973_p12 = scmp.lt.s32.totalorder %s2197_s12, %s1971_s10 }
  0x47   : > { %p1968_p7 = pnand %p1966_p9, %p1952_p13  ;;  %p1974_p0 = scmp.lt.s32.totalorder %s1972_s11, %s1965_s29 }
  0x49   : > { %p1969_p10 = pneg %p1968_p7  ;;  %p1975_p3 = por %p1974_p0, %p1973_p12 }
  0x4b   : > { %p1976_p6 = pnand %p1975_p3, %p1969_p10 }
  0x4d   : > { %1979 = shalt.err (!%p1976_p6)
}
  0x4e   : > { %1717 = dma.hbm_to_vmem [thread:$0]  (!%p2203_p11), %s2195_s30, 64, %s2197_s12, %s190_s23  }
  0x4f   : > { %p3194_p2 = scmp.ne.s32.totalorder %s3188_s26, 0 }
  0x51   : > { %211 = sbr.rel (%p3194_p2) target bundleno = 1362 (0x552), region = 32 }
  0x58   : > { %s213_s14 = sand.u32 1, %s2026_s16   ;;  %p3195_p13 = scmp.ne.s32.totalorder %s3187_s25, 0 }
  0x59   : > { %s1631_s5 = sshll.u32 %s213_s14, 2  ;;  %s214_s1 = scalar_lea.sflag [#allocation3], %s213_s14 }
  0x5a   : > { %s217_s6 = scalar_lea.vmem [#allocation2], %s1631_s5 }
  0x5b   : > { %2013 = dma.done.wait (%p3195_p13), %s214_s1, 64  }
  0x5c   : > { %2015 = vsyncadd (%p3195_p13), %s214_s1, 4294967232  ;;  %p3196_p8 = scmp.ne.s32.totalorder %s3186_s24, 0 }
  0x5e   : > { %2017 = dma.done.wait (%p3196_p8), [#allocation5], 64  }
  0x5f   : > { %2019 = vsyncadd (%p3196_p8), [#allocation5], 4294967232  ;;  %v279_v0 = vld [vmem:[%s217_s6] sm:$0xf]  ;;  %v280_v1 = vld [vmem:[#allocation4] sm:$0xf] }
  0x60   : > { %288 = vxpose.xlu0.b32.start.end [1/1] (short) %v279_v0, 128  ;;  %vm369_vm0 = vcmask 1043456   ;;  %vm320_vm1 = vcmask 31744   ;;  %v2054_v18 = vmov 5   ;;  %v3162_v19 = vmov 4   ;;  %v2264_v20 = vld [vmem:[%s3153_s2] ss:$0 sm:$0xff] }
  0x61   : > { %1676 = vmatprep.subr.msk.mxu0 %vm369_vm0, %v280_v1  ;;  %1702 = vmatprep.subr.msk.mxu1 %vm369_vm0, %v280_v1  ;;  %s2056_s26 = smov 124   ;;  %v2057_v35 = vmov 7   ;;  %v3161_v40 = vmov 6   ;;  %s2059_s30 = smov 120  }
  0x62   : > { %1677 = vmatpush3.msk.msra.mxu0 %vm369_vm0, %v280_v1  ;;  %1703 = vmatpush3.msk.msra.mxu1 %vm369_vm0, %v280_v1  ;;  %s2060_s12 = smov 4   ;;  %s1633_s27 = sshll.u32 %s2034_s18, 4 }
  0x63   : > { %1794 = vset.pattern.permute.xlu1 %v3162_v19  ;;  %p260_p11 = scmp.lt.s32.totalorder %s2038_s19, 1  ;;  %p262_p1 = scmp.lt.s32.totalorder %s1633_s27, 31 }
  0x65   : > { %s3273_s19 = smov (!%p260_p11, %s2038_s19), 1  ;;  %s3275_s27 = smov (!%p262_p1, %s1633_s27), 31 }
  0x66   : > { %s1634_s23 = sshll.u32 %s3273_s19, 5 }
  0x67   : > { %s2708_s18 = sadd.s32 %s1634_s23, %s3275_s27 }
  0x68   : > { %s1635_s28 = sshll.u32 %s2708_s18, 3 }
  0x69   : > { %s2724_s8 = scalar_lea.vmem %s3155_s4, %s1635_s28  ;;  %s2924_s10 = scalar_lea.vmem %s3154_s3, %s1635_s28 }
  0x89   : > { %1795 = vset.pattern.permute.xlu0 %v2054_v18 }
  0xe0   : > { %v304_v2 = vpop.trf.xlu0 }
  0xe1   : > { %1678 = vmatprep.mubr.msk.f32.mxu0 %vm320_vm1, %v304_v2 }
  0xe4   : > { %v305_v3 = vpop.trf.xlu0 }
  0xe5   : > { %1679 = vmatmul.mubr.msk.f32.vlgmr.msra.gmra.mrb[0].mxu0 %vm320_vm1, %v305_v3 }
  0xe8   : > { %v306_v4 = vpop.trf.xlu0 }
  0xe9   : > { %1681 = vmatprep.mubr.msk.f32.mxu0 %vm320_vm1, %v306_v4 }
  0xec   : > { %v307_v5 = vpop.trf.xlu0 }
  0xed   : > { %1682 = vmatmul.mubr.msk.f32.gmra.mrb[2].mxu0 %vm320_vm1, %v307_v5 }
  0xf0   : > { %v308_v6 = vpop.trf.xlu0 }
  0xf1   : > { %1684 = vmatprep.mubr.msk.f32.mxu0 %vm320_vm1, %v308_v6 }
  0xf4   : > { %v309_v7 = vpop.trf.xlu0 }
  0xf5   : > { %1685 = vmatmul.mubr.msk.f32.gmra.mrb[4].mxu0 %vm320_vm1, %v309_v7 }
  0xf8   : > { %v310_v8 = vpop.trf.xlu0 }
  0xf9   : > { %1687 = vmatprep.mubr.msk.f32.mxu0 %vm320_vm1, %v310_v8 }
  0xfc   : > { %v311_v9 = vpop.trf.xlu0 }
  0xfd   : > { %1688 = vmatmul.mubr.msk.f32.gmra.mrb[6].mxu0 %vm320_vm1, %v311_v9 }
 0x100   : > { %v312_v10 = vpop.trf.xlu0 }
 0x101   : > { %1690 = vmatprep.mubr.msk.f32.mxu1 %vm320_vm1, %v312_v10 }
 0x104   : > { %v313_v11 = vpop.trf.xlu0 }
 0x105   : > { %1691 = vmatmul.mubr.msk.f32.vlgmr.msra.gmra.mrb[0].mxu1 %vm320_vm1, %v313_v11 }
 0x108   : > { %v314_v12 = vpop.trf.xlu0 }
 0x109   : > { %1693 = vmatprep.mubr.msk.f32.mxu1 %vm320_vm1, %v314_v12 }
 0x10c   : > { %v315_v13 = vpop.trf.xlu0 }
 0x10d   : > { %1694 = vmatmul.mubr.msk.f32.gmra.mrb[2].mxu1 %vm320_vm1, %v315_v13 }
 0x110   : > { %v316_v14 = vpop.trf.xlu0 }
 0x111   : > { %1696 = vmatprep.mubr.msk.f32.mxu1 %vm320_vm1, %v316_v14 }
 0x114   : > { %v317_v15 = vpop.trf.xlu0 }
 0x115   : > { %1697 = vmatmul.mubr.msk.f32.gmra.mrb[4].mxu1 %vm320_vm1, %v317_v15 }
 0x118   : > { %v318_v16 = vpop.trf.xlu0 }
 0x119   : > { %1699 = vmatprep.mubr.msk.f32.mxu1 %vm320_vm1, %v318_v16 }
 0x11c   : > { %v319_v17 = vpop.trf.xlu0 }
 0x11d   : > { %1700 = vmatmul.mubr.msk.f32.gmra.mrb[6].mxu1 %vm320_vm1, %v319_v17 }
 0x1b8   : > { %v1680_v21 = vpop.f32.mrb[0].mxu0 }
 0x1b9   : > { %v2267_v22 = vadd.f32 %v1680_v21, %v2264_v20  ;;  %v439_v23 = vpop.f32.mrb[1].mxu0 }
 0x1ba   : > { %v2271_v25 = vadd.f32 %v2264_v20, %v439_v23 }
 0x1bb   : > { %v552_v24 = vmul.f32 1.442695, %v2267_v22  ;;  %v535_v29 = vadd.f32 1.0, %v2267_v22  ;;  %vm519_vm2 = vcmp.gt.f32.partialorder %v2267_v22, 0.0 }
 0x1bc   : > { %v550_v26 = vmul.f32 1.442695, %v2271_v25  ;;  %v534_v38 = vadd.f32 1.0, %v2271_v25  ;;  %vm518_vm3 = vcmp.gt.f32.partialorder %v2271_v25, 0.0 }
 0x1bd   : > { %1858 = vpow2.f32 %v552_v24 }
 0x1be   : > { %1860 = vpow2.f32 %v550_v26 }
 0x1c0   : > { %v1683_v27 = vpop.f32.mrb[2].mxu0 }
 0x1c1   : > { %v449_v28 = vpop.f32.mrb[3].mxu0  ;;  %v2282_v34 = vadd.f32 %v1683_v27, %v2264_v20 }
 0x1c2   : > { %v2306_v45 = vadd.f32 %v2264_v20, %v449_v28 }
 0x1c3   : > { %v556_v37 = vmul.f32 1.442695, %v2282_v34  ;;  %v537_v51 = vadd.f32 1.0, %v2282_v34  ;;  %vm521_vm4 = vcmp.gt.f32.partialorder %v2282_v34, 0.0 }
 0x1c4   : > { %v554_v50 = vmul.f32 1.442695, %v2306_v45  ;;  %v536_v0 = vadd.f32 1.0, %v2306_v45  ;;  %vm520_vm6 = vcmp.gt.f32.partialorder %v2306_v45, 0.0 }
 0x1c5   : > { %1862 = vpow2.f32 %v556_v37 }
 0x1c7   : > { %v1859_v30 = vpop.eup %1858 }
 0x1c8   : > { %v2276_v31 = vsel %vm519_vm2, %v535_v29, %v1859_v30  ;;  %v1686_v32 = vpop.f32.mrb[4].mxu0  ;;  %v1861_v36 = vpop.eup %1860 }
 0x1c9   : > { %3197 = vst [vmem:[#allocation9_spill] sm:$0xff] %v2276_v31  ;;  %972 = vperm.xlu0 %1795, %v2276_v31   ;;  %616 = vrot.lane.b32.xlu1 %v2276_v31, %s2056_s26  ;;  %v459_v33 = vpop.f32.mrb[5].mxu0  ;;  %v2291_v41 = vsel %vm518_vm3, %v534_v38, %v1861_v36  ;;  %v2299_v43 = vadd.f32 %v1686_v32, %v2264_v20  ;;  %vm870_vm3 = vcmask 64512  }
 0x1ca   : > { %v2323_v53 = vadd.f32 %v2264_v20, %v459_v33 }
 0x1cb   : > { %v560_v44 = vmul.f32 1.442695, %v2299_v43  ;;  %v539_v60 = vadd.f32 1.0, %v2299_v43  ;;  %vm523_vm5 = vcmp.gt.f32.partialorder %v2299_v43, 0.0 }
 0x1cc   : > { %v558_v55 = vmul.f32 1.442695, %v2323_v53  ;;  %v538_v8 = vadd.f32 1.0, %v2323_v53  ;;  %vm522_vm7 = vcmp.gt.f32.partialorder %v2323_v53, 0.0 }
 0x1cd   : > { %1797 = vset.pattern.permute.xlu0 %v2057_v35  ;;  %892 = vperm.xlu1 %1794, %v2276_v31   ;;  %1864 = vpow2.f32 %v560_v44 }
 0x1ce   : > { %1132 = vperm.xlu0 %1797, %v2276_v31   ;;  %1866 = vpow2.f32 %v554_v50 }
 0x1cf   : > { %v1863_v52 = vpop.eup %1862  ;;  %1868 = vpow2.f32 %v558_v55 }
 0x1d0   : > { %v1689_v39 = vpop.f32.mrb[6].mxu0  ;;  %v2326_v54 = vsel %vm521_vm4, %v537_v51, %v1863_v52  ;;  %vm1431_vm4 = vcmask 97280  }
 0x1d1   : > { %1796 = vset.pattern.permute.xlu1 %v3161_v40  ;;  %v2293_v42 = vpop.f32.mrb[7].mxu0  ;;  %3199 = vst [vmem:[#allocation11_spill] sm:$0xff] %v2326_v54  ;;  %v2345_v62 = vadd.f32 %v1689_v39, %v2264_v20 }
 0x1d2   : > { %1052 = vperm.xlu1 %1796, %v2276_v31   ;;  %614 = vrot.lane.b32.xlu0 %v2291_v41, %s2056_s26  ;;  %v2373_v10 = vadd.f32 %v2264_v20, %v2293_v42 }
 0x1d3   : > { %1798 = vset.pattern.permute.xlu0 %v3162_v19  ;;  %v564_v5 = vmul.f32 1.442695, %v2345_v62  ;;  %v541_v17 = vadd.f32 1.0, %v2345_v62  ;;  %vm525_vm8 = vcmp.gt.f32.partialorder %v2345_v62, 0.0 }
 0x1d4   : > { %v562_v16 = vmul.f32 1.442695, %v2373_v10  ;;  %v540_v24 = vadd.f32 1.0, %v2373_v10  ;;  %vm524_vm9 = vcmp.gt.f32.partialorder %v2373_v10, 0.0 }
 0x1d5   : > { %1870 = vpow2.f32 %v564_v5 }
 0x1d6   : > { %1799 = vset.pattern.permute.xlu1 %v2054_v18  ;;  %888 = vperm.xlu0 %1798, %v2291_v41   ;;  %1872 = vpow2.f32 %v562_v16 }
 0x1d7   : > { %968 = vperm.xlu1 %1799, %v2291_v41   ;;  %v1865_v61 = vpop.eup %1864 }
 0x1d8   : > { %v1692_v46 = vpop.f32.mrb[0].mxu1  ;;  %v2347_v63 = vsel %vm523_vm5, %v539_v60, %v1865_v61  ;;  %v1867_v2 = vpop.eup %1866  ;;  %vm1448_vm5 = vcmask 130048  }
 0x1d9   : > { %v2310_v47 = vadd.f32 %v1692_v46, %v2264_v20  ;;  %v479_v48 = vpop.f32.mrb[1].mxu1  ;;  %3201 = vst [vmem:[#allocation13_spill] sm:$0xff] %v2347_v63  ;;  %v2362_v7 = vsel %vm520_vm6, %v536_v0, %v1867_v2  ;;  %v1869_v9 = vpop.eup %1868 }
 0x1da   : > { %1800 = vset.pattern.permute.xlu0 %v3161_v40  ;;  %v2314_v49 = vadd.f32 %v2264_v20, %v479_v48  ;;  %3203 = vst [vmem:[#allocation15_spill] sm:$0xff] %v2362_v7  ;;  %v2376_v12 = vsel %vm522_vm7, %v538_v8, %v1869_v9 }
 0x1db   : > { %3198 = vst [vmem:[#allocation10_spill] sm:$0xff] %v2310_v47  ;;  %1801 = vset.pattern.permute.xlu1 %v2057_v35  ;;  %1048 = vperm.xlu0 %1800, %v2291_v41   ;;  %3204 = vst [vmem:[#allocation16_spill] sm:$0xff] %v2376_v12  ;;  %v568_v23 = vmul.f32 1.442695, %v2310_v47  ;;  %v543_v29 = vadd.f32 1.0, %v2310_v47  ;;  %vm527_vm10 = vcmp.gt.f32.partialorder %v2310_v47, 0.0 }
 0x1dc   : > { %1128 = vperm.xlu1 %1801, %v2291_v41   ;;  %v566_v28 = vmul.f32 1.442695, %v2314_v49  ;;  %v542_v36 = vadd.f32 1.0, %v2314_v49  ;;  %vm526_vm11 = vcmp.gt.f32.partialorder %v2314_v49, 0.0 }
 0x1dd   : > { %1874 = vpow2.f32 %v568_v23 }
 0x1de   : > { %1876 = vpow2.f32 %v566_v28 }
 0x1df   : > { %1802 = vset.pattern.permute.xlu0 %v3162_v19  ;;  %v1871_v21 = vpop.eup %1870 }
 0x1e0   : > { %900 = vperm.xlu0 %1802, %v2326_v54   ;;  %620 = vrot.lane.b32.xlu1 %v2326_v54, %s2056_s26  ;;  %v1695_v56 = vpop.f32.mrb[2].mxu1  ;;  %v1873_v26 = vpop.eup %1872 }
 0x1e1   : > { %1803 = vset.pattern.permute.xlu1 %v2054_v18  ;;  %v2334_v57 = vadd.f32 %v1695_v56, %v2264_v20  ;;  %v489_v58 = vpop.f32.mrb[3].mxu1  ;;  %v2409_v27 = vsel %vm524_vm9, %v540_v24, %v1873_v26 }
 0x1e2   : > { %v2337_v59 = vadd.f32 %v2264_v20, %v489_v58 }
 0x1e3   : > { %3200 = vst [vmem:[#allocation12_spill] sm:$0xff] %v2334_v57  ;;  %v572_v33 = vmul.f32 1.442695, %v2334_v57  ;;  %v545_v42 = vadd.f32 1.0, %v2334_v57  ;;  %vm529_vm12 = vcmp.gt.f32.partialorder %v2334_v57, 0.0 }
 0x1e4   : > { %1804 = vset.pattern.permute.xlu0 %v3161_v40  ;;  %980 = vperm.xlu1 %1803, %v2326_v54   ;;  %v570_v39 = vmul.f32 1.442695, %v2337_v59  ;;  %v544_v50 = vadd.f32 1.0, %v2337_v59  ;;  %vm528_vm13 = vcmp.gt.f32.partialorder %v2337_v59, 0.0 }
 0x1e5   : > { %1060 = vperm.xlu0 %1804, %v2326_v54   ;;  %1878 = vpow2.f32 %v572_v33 }
 0x1e6   : > { %1880 = vpow2.f32 %v570_v39 }
 0x1e7   : > { %v1875_v30 = vpop.eup %1874 }
 0x1e8   : > { %1805 = vset.pattern.permute.xlu1 %v2057_v35  ;;  %v1698_v1 = vpop.f32.mrb[4].mxu1  ;;  %v2421_v32 = vsel %vm527_vm10, %v543_v29, %v1875_v30  ;;  %v1877_v37 = vpop.eup %1876 }
 0x1e9   : > { %1810 = vset.pattern.permute.xlu0 %v3162_v19  ;;  %1140 = vperm.xlu1 %1805, %v2326_v54   ;;  %v2355_v3 = vadd.f32 %v1698_v1, %v2264_v20  ;;  %v499_v4 = vpop.f32.mrb[5].mxu1  ;;  %v2435_v38 = vsel %vm526_vm11, %v542_v36, %v1877_v37 }
 0x1ea   : > { %908 = vperm.xlu0 %1810, %v2347_v63   ;;  %v2360_v6 = vadd.f32 %v2264_v20, %v499_v4 }
 0x1eb   : > { %3202 = vst [vmem:[#allocation14_spill] sm:$0xff] %v2355_v3  ;;  %v576_v48 = vmul.f32 1.442695, %v2355_v3  ;;  %v547_v56 = vadd.f32 1.0, %v2355_v3  ;;  %vm531_vm14 = vcmp.gt.f32.partialorder %v2355_v3, 0.0  ;;  %v3214_v3 = vmov 4  }
 0x1ec   : > { %v574_v55 = vmul.f32 1.442695, %v2360_v6  ;;  %v546_v0 = vadd.f32 1.0, %v2360_v6  ;;  %vm530_vm15 = vcmp.gt.f32.partialorder %v2360_v6, 0.0 }
 0x1ed   : > { %618 = vrot.lane.b32.xlu1 %v2362_v7, %s2056_s26  ;;  %1882 = vpow2.f32 %v576_v48 }
 0x1ee   : > { %1812 = vset.pattern.permute.xlu0 %v3161_v40  ;;  %1806 = vset.pattern.permute.xlu1 %v3162_v19  ;;  %1884 = vpow2.f32 %v574_v55 }
 0x1ef   : > { %1068 = vperm.xlu0 %1812, %v2347_v63   ;;  %v1879_v44 = vpop.eup %1878 }
 0x1f0   : > { %v1701_v11 = vpop.f32.mrb[6].mxu1  ;;  %v2449_v46 = vsel %vm529_vm12, %v545_v42, %v1879_v44  ;;  %v1881_v51 = vpop.eup %1880 }
 0x1f1   : > { %896 = vperm.xlu1 %1806, %v2362_v7   ;;  %v2379_v13 = vadd.f32 %v1701_v11, %v2264_v20  ;;  %v509_v14 = vpop.f32.mrb[7].mxu1  ;;  %3206 = vst [vmem:[#allocation18_spill] sm:$0xff] %v2449_v46  ;;  %v2463_v52 = vsel %vm528_vm13, %v544_v50, %v1881_v51 }
 0x1f2   : > { %v2382_v15 = vadd.f32 %v2264_v20, %v509_v14  ;;  %v2395_v20 = vsel %vm525_vm8, %v541_v17, %v1871_v21  ;;  %3207 = vst [vmem:[#allocation19_spill] sm:$0xff] %v2463_v52 }
 0x1f3   : > { %3205 = vst [vmem:[#allocation17_spill] sm:$0xff] %v2379_v13  ;;  %1815 = vset.pattern.permute.xlu0 %v2054_v18  ;;  %v580_v61 = vmul.f32 1.442695, %v2379_v13  ;;  %v549_v5 = vadd.f32 1.0, %v2379_v13  ;;  %vm533_vm0 = vcmp.gt.f32.partialorder %v2379_v13, 0.0 }
 0x1f4   : > { %984 = vperm.xlu0 %1815, %v2376_v12   ;;  %v578_v4 = vmul.f32 1.442695, %v2382_v15  ;;  %v548_v24 = vadd.f32 1.0, %v2382_v15  ;;  %vm532_vm2 = vcmp.gt.f32.partialorder %v2382_v15, 0.0 }
 0x1f5   : > { %1807 = vset.pattern.permute.xlu1 %v2054_v18  ;;  %1886 = vpow2.f32 %v580_v61 }
 0x1f6   : > { %976 = vperm.xlu1 %1807, %v2362_v7   ;;  %1888 = vpow2.f32 %v578_v4 }
 0x1f7   : > { %v1883_v58 = vpop.eup %1882 }
 0x1f8   : > { %1817 = vset.pattern.permute.xlu0 %v2057_v35  ;;  %v2475_v60 = vsel %vm531_vm14, %v547_v56, %v1883_v58  ;;  %v1885_v1 = vpop.eup %1884 }
 0x1f9   : > { %1144 = vperm.xlu0 %1817, %v2376_v12   ;;  %3208 = vst [vmem:[#allocation20_spill] sm:$0xff] %v2475_v60  ;;  %v2490_v2 = vsel %vm530_vm15, %v546_v0, %v1885_v1 }
 0x1fa   : > { %1808 = vset.pattern.permute.xlu1 %v3161_v40  ;;  %3209 = vst [vmem:[#allocation21_spill] sm:$0xff] %v2490_v2 }
 0x1fb   : > { %1056 = vperm.xlu1 %1808, %v2362_v7  }
 0x1fd   : > { %1818 = vset.pattern.permute.xlu0 %v3162_v19 }
 0x1fe   : > { %916 = vperm.xlu0 %1818, %v2395_v20  }
 0x1ff   : > { %1809 = vset.pattern.permute.xlu1 %v2057_v35  ;;  %v1887_v8 = vpop.eup %1886 }
 0x200   : > { %1136 = vperm.xlu1 %1809, %v2362_v7   ;;  %v2507_v14 = vsel %vm533_vm0, %v549_v5, %v1887_v8  ;;  %v1889_v26 = vpop.eup %1888 }
 0x201   : > { %3210 = vst [vmem:[#allocation22_spill] sm:$0xff] %v2507_v14  ;;  %v2528_v29 = vsel %vm532_vm2, %v548_v24, %v1889_v26 }
 0x202   : > { %1820 = vset.pattern.permute.xlu0 %v3161_v40 }
 0x203   : > { %1076 = vperm.xlu0 %1820, %v2395_v20  }
 0x204   : > { %624 = vrot.lane.b32.xlu1 %v2347_v63, %s2056_s26 }
 0x205   : > { %1811 = vset.pattern.permute.xlu1 %v2054_v18 }
 0x207   : > { %1823 = vset.pattern.permute.xlu0 %v2054_v18 }
 0x208   : > { %988 = vperm.xlu1 %1811, %v2347_v63   ;;  %992 = vperm.xlu0 %1823, %v2409_v27  }
 0x20c   : > { %1813 = vset.pattern.permute.xlu1 %v2057_v35  ;;  %1825 = vset.pattern.permute.xlu0 %v2057_v35 }
 0x20d   : > { %1148 = vperm.xlu1 %1813, %v2347_v63   ;;  %1152 = vperm.xlu0 %1825, %v2409_v27  }
 0x211   : > { %622 = vrot.lane.b32.xlu1 %v2376_v12, %s2056_s26  ;;  %1826 = vset.pattern.permute.xlu0 %v3162_v19 }
 0x212   : > { %924 = vperm.xlu0 %1826, %v2421_v32   ;;  %1814 = vset.pattern.permute.xlu1 %v3162_v19 }
 0x215   : > { %904 = vperm.xlu1 %1814, %v2376_v12  }
 0x216   : > { %1828 = vset.pattern.permute.xlu0 %v3161_v40 }
 0x217   : > { %1084 = vperm.xlu0 %1828, %v2421_v32  }
 0x219   : > { %1816 = vset.pattern.permute.xlu1 %v3161_v40 }
 0x21a   : > { %1064 = vperm.xlu1 %1816, %v2376_v12  }
 0x21b   : > { %1831 = vset.pattern.permute.xlu0 %v2054_v18 }
 0x21c   : > { %1000 = vperm.xlu0 %1831, %v2435_v38  }
 0x21e   : > { %628 = vrot.lane.b32.xlu1 %v2395_v20, %s2056_s26 }
 0x21f   : > { %1819 = vset.pattern.permute.xlu1 %v2054_v18 }
 0x220   : > { %1833 = vset.pattern.permute.xlu0 %v2057_v35 }
 0x221   : > { %1160 = vperm.xlu0 %1833, %v2435_v38  }
 0x222   : > { %996 = vperm.xlu1 %1819, %v2395_v20  }
 0x225   : > { %1834 = vset.pattern.permute.xlu0 %v3162_v19 }
 0x226   : > { %1821 = vset.pattern.permute.xlu1 %v2057_v35  ;;  %932 = vperm.xlu0 %1834, %v2449_v46  }
 0x227   : > { %1156 = vperm.xlu1 %1821, %v2395_v20  }
 0x22a   : > { %1836 = vset.pattern.permute.xlu0 %v3161_v40 }
 0x22b   : > { %626 = vrot.lane.b32.xlu1 %v2409_v27, %s2056_s26  ;;  %1092 = vperm.xlu0 %1836, %v2449_v46  }
 0x22c   : > { %1822 = vset.pattern.permute.xlu1 %v3162_v19 }
 0x22f   : > { %912 = vperm.xlu1 %1822, %v2409_v27   ;;  %1839 = vset.pattern.permute.xlu0 %v2054_v18 }
 0x230   : > { %1008 = vperm.xlu0 %1839, %v2463_v52  }
 0x233   : > { %1824 = vset.pattern.permute.xlu1 %v3161_v40 }
 0x234   : > { %1072 = vperm.xlu1 %1824, %v2409_v27   ;;  %1841 = vset.pattern.permute.xlu0 %v2057_v35 }
 0x235   : > { %1168 = vperm.xlu0 %1841, %v2463_v52  }
 0x238   : > { %632 = vrot.lane.b32.xlu1 %v2421_v32, %s2056_s26 }
 0x239   : > { %1842 = vset.pattern.permute.xlu0 %v3162_v19  ;;  %1827 = vset.pattern.permute.xlu1 %v2054_v18 }
 0x23a   : > { %940 = vperm.xlu0 %1842, %v2475_v60  }
 0x23b   : > { %v2499_v9 = vpop.permute.xlu1 %616 }
 0x23c   : > { %1004 = vperm.xlu1 %1827, %v2421_v32  }
 0x23e   : > { %1844 = vset.pattern.permute.xlu0 %v3161_v40 }
 0x23f   : > { %1100 = vperm.xlu0 %1844, %v2475_v60  }
 0x240   : > { %1829 = vset.pattern.permute.xlu1 %v2057_v35 }
 0x241   : > { %1164 = vperm.xlu1 %1829, %v2421_v32  }
 0x243   : > { %1847 = vset.pattern.permute.xlu0 %v2054_v18 }
 0x244   : > { %1016 = vperm.xlu0 %1847, %v2490_v2  }
 0x245   : > { %630 = vrot.lane.b32.xlu1 %v2435_v38, %s2056_s26 }
 0x246   : > { %1830 = vset.pattern.permute.xlu1 %v3162_v19 }
 0x248   : > { %1849 = vset.pattern.permute.xlu0 %v2057_v35  ;;  %v2502_v11 = vpop.permute.xlu0 %972 }
 0x249   : > { %920 = vperm.xlu1 %1830, %v2435_v38   ;;  %1176 = vperm.xlu0 %1849, %v2490_v2  }
 0x24c   : > { %v2509_v16 = vpop.permute.xlu1 %892 }
 0x24d   : > { %1832 = vset.pattern.permute.xlu1 %v3161_v40  ;;  %1850 = vset.pattern.permute.xlu0 %v3162_v19  ;;  %v2513_v17 = vpop.permute.xlu0 %1132 }
 0x24e   : > { %1080 = vperm.xlu1 %1832, %v2435_v38   ;;  %948 = vperm.xlu0 %1850, %v2507_v14  }
 0x251   : > { %v2517_v21 = vpop.permute.xlu1 %1052  ;;  %v2519_v23 = vpop.permute.xlu0 %614 }
 0x252   : > { %636 = vrot.lane.b32.xlu1 %v2449_v46, %s2056_s26  ;;  %1852 = vset.pattern.permute.xlu0 %v3161_v40 }
 0x253   : > { %1108 = vperm.xlu0 %1852, %v2507_v14   ;;  %1835 = vset.pattern.permute.xlu1 %v2054_v18 }
 0x255   : > { %v889_v28 = vpop.permute.xlu0 %888 }
 0x256   : > { %v969_v30 = vpop.permute.xlu1 %968  ;;  %1012 = vperm.xlu1 %1835, %v2449_v46   ;;  %v951_v37 = vmul.f32 %v889_v28, %v2271_v25 }
 0x257   : > { %1855 = vset.pattern.permute.xlu0 %v2054_v18  ;;  %v1031_v44 = vmul.f32 %v969_v30, %v2271_v25 }
 0x258   : > { %1024 = vperm.xlu0 %1855, %v2528_v29  }
 0x25a   : > { %1837 = vset.pattern.permute.xlu1 %v2057_v35  ;;  %v2534_v33 = vpop.permute.xlu0 %1048 }
 0x25b   : > { %v1129_v36 = vpop.permute.xlu1 %1128  ;;  %1172 = vperm.xlu1 %1837, %v2449_v46  }
 0x25c   : > { %1857 = vset.pattern.permute.xlu0 %v2057_v35  ;;  %v1191_v51 = vmul.f32 %v1129_v36, %v2271_v25 }
 0x25d   : > { %1184 = vperm.xlu0 %1857, %v2528_v29  }
 0x25f   : > { %v2540_v39 = vpop.permute.xlu1 %620  ;;  %634 = vrot.lane.b32.xlu1 %v2463_v52, %s2056_s26  ;;  %v2544_v42 = vpop.permute.xlu0 %900 }
 0x260   : > { %1838 = vset.pattern.permute.xlu1 %v3162_v19 }
 0x261   : > { %1223 = vrot.lane.b32.xlu0 %v951_v37, %s2059_s30 }
 0x263   : > { %v2549_v48 = vpop.permute.xlu1 %980  ;;  %928 = vperm.xlu1 %1838, %v2463_v52  }
 0x264   : > { %v2552_v50 = vpop.permute.xlu0 %1060 }
 0x265   : > { %1287 = vrot.lane.b32.xlu0 %v1031_v44, %s2056_s26 }
 0x267   : > { %1840 = vset.pattern.permute.xlu1 %v3161_v40 }
 0x268   : > { %v2557_v55 = vpop.permute.xlu1 %1140  ;;  %1088 = vperm.xlu1 %1840, %v2463_v52  }
 0x269   : > { %1351 = vrot.lane.b32.xlu0 %v1191_v51, %s2060_s12  ;;  %v2561_v56 = vpop.permute.xlu0 %908 }
 0x26c   : > { %v2563_v58 = vpop.permute.xlu1 %618  ;;  %640 = vrot.lane.b32.xlu1 %v2475_v60, %s2056_s26 }
 0x26d   : > { %1843 = vset.pattern.permute.xlu1 %v2054_v18 }
 0x26e   : > { %v2568_v61 = vpop.permute.xlu0 %1068 }
 0x26f   : > { %3211 = vst [vmem:[#allocation23_spill] sm:$0xff] %v2568_v61 }
 0x270   : > { %v897_v0 = vpop.permute.xlu1 %896  ;;  %1020 = vperm.xlu1 %1843, %v2475_v60  }
 0x273   : > { %v985_v1 = vpop.permute.xlu0 %984 }
 0x274   : > { %1845 = vset.pattern.permute.xlu1 %v2057_v35 }
 0x275   : > { %v977_v4 = vpop.permute.xlu1 %976  ;;  %1180 = vperm.xlu1 %1845, %v2475_v60  }
 0x278   : > { %v1145_v5 = vpop.permute.xlu0 %1144 }
 0x279   : > { %638 = vrot.lane.b32.xlu1 %v2490_v2, %s2056_s26 }
 0x27a   : > { %v2575_v8 = vpop.permute.xlu1 %1056  ;;  %1846 = vset.pattern.permute.xlu1 %v3162_v19 }
 0x27d   : > { %936 = vperm.xlu1 %1846, %v2490_v2   ;;  %v2579_v24 = vpop.permute.xlu0 %916 }
 0x27f   : > { %v1137_v26 = vpop.permute.xlu1 %1136 }
 0x280   : > { %v1193_v46 = vmul.f32 %v1137_v26, %v2306_v45  ;;  %v663_v26 = vmul.f32 %v2499_v9, %v2276_v31  ;;  %v665_v9 = vmul.f32 %v2540_v39, %v2326_v54 }
 0x281   : > { %1848 = vset.pattern.permute.xlu1 %v3161_v40 }
 0x282   : > { %1096 = vperm.xlu1 %1848, %v2490_v2   ;;  %v2583_v28 = vpop.permute.xlu0 %1076 }
 0x283   : > { %3212 = vst [vmem:[#allocation24_spill] sm:$0xff] %v2583_v28  ;;  %v2585_v30 = vpop.permute.xlu1 %624 }
 0x286   : > { %644 = vrot.lane.b32.xlu1 %v2507_v14, %s2056_s26 }
 0x287   : > { %v2589_v36 = vpop.permute.xlu1 %988  ;;  %v993_v37 = vpop.permute.xlu0 %992  ;;  %1851 = vset.pattern.permute.xlu1 %v2054_v18 }
 0x28a   : > { %1028 = vperm.xlu1 %1851, %v2507_v14  }
 0x28c   : > { %v2593_v44 = vpop.permute.xlu1 %1148  ;;  %v2595_v51 = vpop.permute.xlu0 %1152 }
 0x28e   : > { %1853 = vset.pattern.permute.xlu1 %v2057_v35 }
 0x28f   : > { %1188 = vperm.xlu1 %1853, %v2507_v14   ;;  %v3216_v14 = vmov 6  }
 0x290   : > { %v623_v40 = vpop.permute.xlu1 %622 }
 0x291   : > { %v666_v19 = vmul.f32 %v623_v40, %v2376_v12  ;;  %v2600_v28 = vpop.permute.xlu0 %924 }
 0x292   : > { %3213 = vst [vmem:[#allocation25_spill] sm:$0xff] %v2600_v28  ;;  %v1033_v28 = vmul.f32 %v977_v4, %v2306_v45  ;;  %v1035_v4 = vmul.f32 %v985_v1, %v2323_v53  ;;  %v681_v1 = vsel %vm320_vm1, %v663_v26, 0.0 }
 0x293   : > { %642 = vrot.lane.b32.xlu1 %v2528_v29, %s2056_s26  ;;  %v690_v18 = vsel %vm320_vm1, %v666_v19, 0.0 }
 0x294   : > { %v905_v13 = vpop.permute.xlu1 %904  ;;  %691 = vadd.xlane.f32.xlu0 %v690_v18  ;;  %1854 = vset.pattern.permute.xlu1 %v3214_v3 }
 0x296   : > { %v2606_v57 = vpop.permute.xlu0 %1084 }
 0x297   : > { %3215 = vst [vmem:[#allocation26_spill] sm:$0xff] %v2606_v57  ;;  %944 = vperm.xlu1 %1854, %v2528_v29   ;;  %v953_v57 = vmul.f32 %v897_v0, %v2306_v45  ;;  %v955_v0 = vmul.f32 %v905_v13, %v2323_v53 }
 0x299   : > { %v2609_v35 = vpop.permute.xlu1 %1064 }
 0x29b   : > { %1856 = vset.pattern.permute.xlu1 %v3216_v14  ;;  %v1001_v40 = vpop.permute.xlu0 %1000 }
 0x29c   : > { %1104 = vperm.xlu1 %1856, %v2528_v29  }
 0x29d   : > { %v2613_v60 = vpop.permute.xlu1 %628 }
 0x2a0   : > { %v2615_v12 = vpop.permute.xlu0 %1160 }
 0x2a1   : > { %v2617_v19 = vpop.permute.xlu1 %996 }
 0x2a5   : > { %v2619_v18 = vpop.permute.xlu0 %932 }
 0x2a6   : > { %3217 = vst [vmem:[#allocation27_spill] sm:$0xff] %v2619_v18  ;;  %v2621_v3 = vpop.permute.xlu1 %1156 }
 0x2a7   : > { %3218 = vst [vmem:[#allocation28_spill] sm:$0xff] %v2621_v3 }
 0x2aa   : > { %v2624_v61 = vpop.permute.xlu1 %626  ;;  %1227 = vrot.lane.b32.xlu0 %v953_v57, %s2059_s30  ;;  %v2627_v14 = vpop.permute.xlu0 %1092 }
 0x2ab   : > { %3219 = vst [vmem:[#allocation29_spill] sm:$0xff] %v2627_v14 }
 0x2ae   : > { %v913_v47 = vpop.permute.xlu1 %912  ;;  %1291 = vrot.lane.b32.xlu0 %v1033_v28, %s2056_s26  ;;  %v1195_v28 = vmul.f32 %v1145_v5, %v2323_v53 }
 0x2af   : > { %v2631_v52 = vpop.permute.xlu0 %1008 }
 0x2b2   : > { %1355 = vrot.lane.b32.xlu0 %v1193_v46, %s2060_s12 }
 0x2b3   : > { %v2635_v3 = vpop.permute.xlu1 %1072 }
 0x2b4   : > { %3220 = vst [vmem:[#allocation30_spill] sm:$0xff] %v2635_v3  ;;  %v2638_v18 = vpop.permute.xlu0 %1168 }
 0x2b6   : > { %1231 = vrot.lane.b32.xlu0 %v955_v0, %s2059_s30  ;;  %v662_v0 = vmul.f32 %v2519_v23, %v2291_v41  ;;  %v687_v23 = vsel %vm320_vm1, %v665_v9, 0.0 }
 0x2b7   : > { %v2641_v57 = vpop.permute.xlu1 %632 }
 0x2b9   : > { %v2644_v14 = vpop.permute.xlu0 %940 }
 0x2ba   : > { %3221 = vst [vmem:[#allocation31_spill] sm:$0xff] %v2644_v14  ;;  %1295 = vrot.lane.b32.xlu0 %v1035_v4, %s2056_s26  ;;  %v957_v14 = vmul.f32 %v913_v47, %v2373_v10  ;;  %v678_v4 = vsel %vm320_vm1, %v662_v0, 0.0  ;;  %v664_v47 = vmul.f32 %v2563_v58, %v2362_v7  ;;  %v1039_v0 = vmul.f32 %v1001_v40, %v2314_v49 }
 0x2bb   : > { %v2649_v46 = vpop.permute.xlu1 %1004  ;;  %v952_v40 = vmul.f32 %v2509_v16, %v2267_v22  ;;  %v1192_v16 = vmul.f32 %v2513_v17, %v2267_v22 }
 0x2be   : > { %1359 = vrot.lane.b32.xlu0 %v1195_v28, %s2060_s12  ;;  %v2653_v13 = vpop.permute.xlu0 %1100  ;;  %v1037_v28 = vmul.f32 %v993_v37, %v2373_v10  ;;  %v684_v37 = vsel %vm320_vm1, %v664_v47, 0.0 }
 0x2bf   : > { %3222 = vst [vmem:[#allocation32_spill] sm:$0xff] %v2653_v13 }
 0x2c0   : > { %v2659_v3 = vpop.permute.xlu1 %1164  ;;  %682 = vadd.xlane.f32.xlu1 %v681_v1 }
 0x2c2   : > { %1235 = vrot.lane.b32.xlu0 %v957_v14, %s2059_s30 }
 0x2c3   : > { %v2664_v5 = vpop.permute.xlu0 %1016 }
 0x2c4   : > { %v2668_v31 = vpop.permute.xlu1 %630  ;;  %679 = vadd.xlane.f32.xlu1 %v678_v4 }
 0x2c6   : > { %1299 = vrot.lane.b32.xlu0 %v1037_v28, %s2056_s26 }
 0x2c8   : > { %v921_v14 = vpop.permute.xlu1 %920  ;;  %688 = vadd.xlane.f32.xlu1 %v687_v23  ;;  %v2674_v39 = vpop.permute.xlu0 %1176 }
 0x2c9   : > { %v959_v26 = vmul.f32 %v921_v14, %v2314_v49 }
 0x2cb   : > { %1239 = vrot.lane.b32.xlu0 %v959_v26, %s2059_s30 }
 0x2cc   : > { %685 = vadd.xlane.f32.xlu1 %v684_v37  ;;  %v1032_v37 = vmul.f32 %v2502_v11, %v2267_v22  ;;  %v1111_v11 = vmul.f32 %v2534_v33, %v2271_v25 }
 0x2cd   : > { %v2680_v1 = vpop.permute.xlu1 %1080  ;;  %v2682_v58 = vpop.permute.xlu0 %948 }
 0x2ce   : > { %3223 = vst [vmem:[#allocation33_spill] sm:$0xff] %v2682_v58 }
 0x2cf   : > { %1303 = vrot.lane.b32.xlu0 %v1039_v0, %s2056_s26 }
 0x2d1   : > { %v2685_v9 = vpop.permute.xlu1 %636 }
 0x2d2   : > { %v2687_v4 = vpop.permute.xlu0 %1108 }
 0x2d3   : > { %3224 = vst [vmem:[#allocation34_spill] sm:$0xff] %v2687_v4 }
 0x2d5   : > { %v2689_v28 = vpop.permute.xlu1 %1012 }
 0x2d7   : > { %v2693_v23 = vpop.permute.xlu0 %1024 }
 0x2da   : > { %v2695_v47 = vpop.permute.xlu1 %1172 }
 0x2dc   : > { %v2700_v14 = vpop.permute.xlu0 %1184 }
 0x2dd   : > { %3225 = vst [vmem:[#allocation35_spill] sm:$0xff] %v2700_v14  ;;  %1225 = vrot.lane.b32.xlu1 %v952_v40, %s2059_s30 }
 0x2de   : > { %v2703_v26 = vpop.permute.xlu1 %634 }
 0x2e0   : > { %v1224_v0 = vpop.permute.xlu0 %1223 }
 0x2e1   : > { %1289 = vrot.lane.b32.xlu1 %v1032_v37, %s2056_s26 }
 0x2e2   : > { %v929_v7 = vpop.permute.xlu1 %928 }
 0x2e4   : > { %v1288_v54 = vpop.permute.xlu0 %1287 }
 0x2e5   : > { %v1399_v40 = vsel %vm320_vm1, %v1224_v0, %v1288_v54  ;;  %1353 = vrot.lane.b32.xlu1 %v1192_v16, %s2060_s12 }
 0x2e6   : > { %v1415_v17 = vsel %vm870_vm3, %v1399_v40, %v1111_v11  ;;  %v667_v40 = vmul.f32 %v2585_v30, %v2347_v63 }
 0x2e7   : > { %v2717_v37 = vpop.permute.xlu1 %1088 }
 0x2e8   : > { %v1352_v54 = vpop.permute.xlu0 %1351  ;;  %v693_v11 = vsel %vm320_vm1, %v667_v40, 0.0 }
 0x2e9   : > { %v1432_v0 = vsel %vm1431_vm4, %v1415_v17, %v1352_v54  ;;  %v961_v54 = vmul.f32 %v929_v7, %v2337_v59  ;;  %v1034_v7 = vmul.f32 %v2549_v48, %v2282_v34  ;;  %v1113_v48 = vmul.f32 %v2575_v8, %v2306_v45 }
 0x2ea   : > { %1449 = vst.msk [vmem:[%s2724_s8] sm:$0xff] %vm1448_vm5, %v1432_v0  ;;  %v1041_v0 = vmul.f32 %v2631_v52, %v2337_v59  ;;  %v1194_v52 = vmul.f32 %v2557_v55, %v2282_v34  ;;  %v1115_v8 = vmul.f32 %v2609_v35, %v2323_v53 }
 0x2eb   : > { %v2730_v16 = vpop.permute.xlu1 %640 }
 0x2ef   : > { %v2732_v33 = vpop.permute.xlu1 %1020 }
 0x2f4   : > { %v2734_v4 = vpop.permute.xlu1 %1180 }
 0x2f5   : > { %3226 = vst [vmem:[#allocation36_spill] sm:$0xff] %v2734_v4 }
 0x2f8   : > { %v639_v13 = vpop.permute.xlu1 %638 }
 0x2f9   : > { %v674_v14 = vmul.f32 %v639_v13, %v2490_v2  ;;  %v954_v13 = vmul.f32 %v2544_v42, %v2282_v34 }
 0x2fb   : > { %v714_v58 = vsel %vm320_vm1, %v674_v14, 0.0 }
 0x2fc   : > { %715 = vadd.xlane.f32.xlu0 %v714_v58  ;;  %v937_v17 = vpop.permute.xlu1 %936 }
 0x301   : > { %v2745_v4 = vpop.permute.xlu1 %1096 }
 0x305   : > { %v2751_v30 = vpop.permute.xlu1 %644 }
 0x309   : > { %694 = vadd.xlane.f32.xlu1 %v693_v11  ;;  %v2758_v58 = vpop.permute.xlu1 %1028 }
 0x30e   : > { %v2763_v40 = vpop.permute.xlu1 %1188 }
 0x30f   : > { %3227 = vst [vmem:[#allocation37_spill] sm:$0xff] %v2763_v40 }
 0x312   : > { %1243 = vrot.lane.b32.xlu0 %v961_v54, %s2059_s30 }
 0x316   : > { %1307 = vrot.lane.b32.xlu0 %v1041_v0, %s2056_s26  ;;  %v643_v0 = vpop.permute.xlu1 %642 }
 0x31a   : > { %1229 = vrot.lane.b32.xlu1 %v954_v13, %s2059_s30 }
 0x31e   : > { %1293 = vrot.lane.b32.xlu1 %v1034_v7, %s2056_s26 }
 0x321   : > { %v2760_v14 = vpop.xlane.xlu0 %691 }
 0x322   : > { %1357 = vrot.lane.b32.xlu1 %v1194_v52, %s2060_s12  ;;  %v676_v52 = vmul.f32 %v643_v0, %v2528_v29  ;;  %v669_v0 = vmul.f32 %v2613_v60, %v2395_v20  ;;  %v1199_v60 = vmul.f32 %v2615_v12, %v2314_v49  ;;  %v956_v12 = vmul.f32 %v2561_v56, %v2299_v43 }
 0x323   : > { %v1196_v56 = vmul.f32 %v2593_v44, %v2299_v43 }
 0x324   : > { %v720_v2 = vsel %vm320_vm1, %v676_v52, 0.0 }
 0x325   : > { %v1228_v42 = vpop.permute.xlu0 %1227 }
 0x329   : > { %v1292_v11 = vpop.permute.xlu0 %1291 }
 0x32a   : > { %v1401_v54 = vsel %vm320_vm1, %v1228_v42, %v1292_v11 }
 0x32b   : > { %v1417_v13 = vsel %vm870_vm3, %v1401_v54, %v1113_v48 }
 0x32d   : > { %v1356_v55 = vpop.permute.xlu0 %1355 }
 0x32e   : > { %v1434_v7 = vsel %vm1431_vm4, %v1417_v13, %v1356_v55  ;;  %v945_v13 = vpop.permute.xlu1 %944  ;;  %v699_v55 = vsel %vm320_vm1, %v669_v0, 0.0 }
 0x32f   : > { %1451 = vst.msk [vmem:[%s2724_s8 + $0x10] sm:$0xff] %vm1448_vm5, %v1434_v7 }
 0x331   : > { %v1232_v63 = vpop.permute.xlu0 %1231 }
 0x332   : > { %v2788_v35 = vpop.permute.xlu1 %1104 }
 0x335   : > { %721 = vadd.xlane.f32.xlu0 %v720_v2  ;;  %v1296_v40 = vpop.permute.xlu0 %1295  ;;  %v668_v2 = vmul.f32 %v2624_v61, %v2409_v27  ;;  %v1201_v61 = vmul.f32 %v2638_v18, %v2337_v59 }
 0x336   : > { %v1403_v42 = vsel %vm320_vm1, %v1232_v63, %v1296_v40  ;;  %v1197_v63 = vmul.f32 %v2595_v51, %v2373_v10 }
 0x337   : > { %v1419_v11 = vsel %vm870_vm3, %v1403_v42, %v1115_v8  ;;  %v696_v40 = vsel %vm320_vm1, %v668_v2, 0.0  ;;  %v963_v42 = vmul.f32 %v937_v17, %v2360_v6  ;;  %v1036_v17 = vmul.f32 %v2589_v36, %v2299_v43 }
 0x338   : > { %v1112_v36 = vmul.f32 %v2517_v21, %v2267_v22 }
 0x339   : > { %v1360_v54 = vpop.permute.xlu0 %1359 }
 0x33a   : > { %v1436_v48 = vsel %vm1431_vm4, %v1419_v11, %v1360_v54  ;;  %v730_v11 = vadd.f32 1e-06, %v2760_v14  ;;  %v1043_v54 = vmul.f32 %v2664_v5, %v2360_v6  ;;  %v965_v5 = vmul.f32 %v945_v13, %v2382_v15 }
 0x33b   : > { %1453 = vst.msk [vmem:[%s2724_s8 + $0x20] sm:$0xff] %vm1448_vm5, %v1436_v48  ;;  %v1203_v48 = vmul.f32 %v2674_v39, %v2360_v6  ;;  %v1045_v39 = vmul.f32 %v2693_v23, %v2382_v15  ;;  %v671_v23 = vmul.f32 %v2641_v57, %v2421_v32  ;;  %v1038_v57 = vmul.f32 %v2617_v19, %v2345_v62 }
 0x346   : > { %700 = vadd.xlane.f32.xlu1 %v699_v55 }
 0x34a   : > { %697 = vadd.xlane.f32.xlu1 %v696_v40 }
 0x34b   : > { %1363 = vrot.lane.b32.xlu0 %v1197_v63, %s2060_s12 }
 0x34d   : > { %v2794_v7 = vpop.xlane.xlu1 %682 }
 0x34f   : > { %1367 = vrot.lane.b32.xlu0 %v1199_v60, %s2060_s12 }
 0x351   : > { %v680_v52 = vpop.xlane.xlu1 %679 }
 0x352   : > { %v726_v51 = vadd.f32 1e-06, %v680_v52 }
 0x353   : > { %1371 = vrot.lane.b32.xlu0 %v1201_v61, %s2060_s12 }
 0x354   : > { %1890 = vrcp.f32 %v726_v51 }
 0x355   : > { %v2801_v8 = vpop.xlane.xlu1 %688  ;;  %1892 = vrcp.f32 %v730_v11  ;;  %v705_v11 = vsel %vm320_vm1, %v671_v23, 0.0 }
 0x357   : > { %1247 = vrot.lane.b32.xlu0 %v963_v42, %s2059_s30 }
 0x359   : > { %v2809_v18 = vpop.xlane.xlu1 %685 }
 0x35b   : > { %1233 = vrot.lane.b32.xlu1 %v956_v12, %s2059_s30  ;;  %1311 = vrot.lane.b32.xlu0 %v1043_v54, %s2056_s26  ;;  %v1236_v54 = vpop.permute.xlu0 %1235 }
 0x35d   : > { %v1226_v0 = vpop.permute.xlu1 %1225 }
 0x35e   : > { %v1891_v55 = vpop.eup %1890 }
 0x35f   : > { %1297 = vrot.lane.b32.xlu1 %v1036_v17, %s2056_s26  ;;  %1375 = vrot.lane.b32.xlu0 %v1203_v48, %s2060_s12  ;;  %v743_v40 = vmul.f32 %v1891_v55, %v680_v52  ;;  %v1893_v61 = vpop.eup %1892  ;;  %v670_v52 = vmul.f32 %v2668_v31, %v2435_v38  ;;  %v1114_v48 = vmul.f32 %v2552_v50, %v2282_v34 }
 0x360   : > { %v751_v21 = vmul.f32 %v1893_v61, %v2760_v14 }
 0x361   : > { %v1290_v2 = vpop.permute.xlu1 %1289  ;;  %v774_v51 = vmul.f32 %v743_v40, %v2271_v25  ;;  %v702_v12 = vsel %vm320_vm1, %v670_v52, 0.0 }
 0x362   : > { %v1400_v63 = vsel %vm320_vm1, %v1226_v0, %v1290_v2  ;;  %v778_v42 = vmul.f32 %v751_v21, %v2323_v53  ;;  %v958_v53 = vmul.f32 %v2579_v24, %v2345_v62  ;;  %v1300_v0 = vpop.permute.xlu0 %1299  ;;  %v3230_v21 = vld [vmem:[#allocation30_spill] sm:$0xff] }
 0x363   : > { %1361 = vrot.lane.b32.xlu1 %v1196_v56, %s2060_s12  ;;  %1251 = vrot.lane.b32.xlu0 %v965_v5, %s2059_s30  ;;  %v1416_v60 = vsel %vm870_vm3, %v1400_v63, %v1112_v36  ;;  %v1405_v61 = vsel %vm320_vm1, %v1236_v54, %v1300_v0 }
 0x365   : > { %v1354_v44 = vpop.permute.xlu1 %1353 }
 0x366   : > { %v1433_v13 = vsel %vm1431_vm4, %v1416_v60, %v1354_v44  ;;  %v1240_v2 = vpop.permute.xlu0 %1239  ;;  %v3229_v60 = vld [vmem:[#allocation19_spill] sm:$0xff] }
 0x367   : > { %1450 = vst.msk [vmem:[%s2724_s8 + $0x8] sm:$0xff] %vm1448_vm5, %v1433_v13  ;;  %1315 = vrot.lane.b32.xlu0 %v1045_v39, %s2056_s26  ;;  %v3228_v39 = vld [vmem:[#allocation18_spill] sm:$0xff]  ;;  %v672_v44 = vmul.f32 %v2703_v26, %v3229_v60  ;;  %v1119_v26 = vmul.f32 %v2680_v1, %v2314_v49 }
 0x368   : > { %v673_v50 = vmul.f32 %v2685_v9, %v3228_v39 }
 0x36a   : > { %v1304_v55 = vpop.permute.xlu0 %1303  ;;  %v711_v13 = vsel %vm320_vm1, %v673_v50, 0.0 }
 0x36b   : > { %806 = vrot.lane.b32.xlu0 %v774_v51, %s2059_s30  ;;  %v1117_v51 = vmul.f32 %v3230_v21, %v2373_v10  ;;  %v1407_v9 = vsel %vm320_vm1, %v1240_v2, %v1304_v55 }
 0x36f   : > { %814 = vrot.lane.b32.xlu0 %v778_v42, %s2059_s30  ;;  %v1421_v42 = vsel %vm870_vm3, %v1405_v61, %v1117_v51 }
 0x387   : > { %706 = vadd.xlane.f32.xlu1 %v705_v11  ;;  %v708_v11 = vsel %vm320_vm1, %v672_v44, 0.0 }
 0x389   : > { %v2860_v63 = vpop.xlane.xlu0 %715 }
 0x38b   : > { %703 = vadd.xlane.f32.xlu1 %v702_v12  ;;  %v1423_v12 = vsel %vm870_vm3, %v1407_v9, %v1119_v26 }
 0x38d   : > { %v1244_v19 = vpop.permute.xlu0 %1243 }
 0x391   : > { %v1308_v36 = vpop.permute.xlu0 %1307 }
 0x396   : > { %v2845_v25 = vpop.xlane.xlu1 %694 }
 0x39a   : > { %v1230_v14 = vpop.permute.xlu1 %1229 }
 0x39c   : > { %1237 = vrot.lane.b32.xlu1 %v958_v53, %s2059_s30 }
 0x39e   : > { %v1294_v31 = vpop.permute.xlu1 %1293 }
 0x39f   : > { %v1402_v17 = vsel %vm320_vm1, %v1230_v14, %v1294_v31  ;;  %v1409_v14 = vsel %vm320_vm1, %v1244_v19, %v1308_v36  ;;  %v1123_v19 = vmul.f32 %v2745_v4, %v2360_v6 }
 0x3a0   : > { %1301 = vrot.lane.b32.xlu1 %v1038_v57, %s2056_s26  ;;  %v1418_v5 = vsel %vm870_vm3, %v1402_v17, %v1114_v48  ;;  %v1121_v57 = vmul.f32 %v2717_v37, %v2337_v59 }
 0x3a2   : > { %v1358_v56 = vpop.permute.xlu1 %1357  ;;  %v1425_v31 = vsel %vm870_vm3, %v1409_v14, %v1121_v57 }
 0x3a3   : > { %v1435_v24 = vsel %vm1431_vm4, %v1418_v5, %v1358_v56  ;;  %v3231_v5 = vld [vmem:[#allocation10_spill] sm:$0xff] }
 0x3a4   : > { %1452 = vst.msk [vmem:[%s2724_s8 + $0x18] sm:$0xff] %vm1448_vm5, %v1435_v24  ;;  %v3232_v24 = vld [vmem:[#allocation25_spill] sm:$0xff]  ;;  %v1040_v61 = vmul.f32 %v2649_v46, %v3231_v5 }
 0x3a5   : > { %v960_v2 = vmul.f32 %v3232_v24, %v3231_v5  ;;  %v3235_v24 = vld [vmem:[#allocation20_spill] sm:$0xff] }
 0x3c2   : > { %v2864_v40 = vpop.xlane.xlu0 %721 }
 0x3c4   : > { %712 = vadd.xlane.f32.xlu1 %v711_v13 }
 0x3c6   : > { %v1364_v23 = vpop.permute.xlu0 %1363 }
 0x3c7   : > { %v1438_v52 = vsel %vm1431_vm4, %v1421_v42, %v1364_v23  ;;  %v3233_v23 = vld [vmem:[#allocation23_spill] sm:$0xff] }
 0x3c8   : > { %1455 = vst.msk [vmem:[%s2724_s8 + $0x30] sm:$0xff] %vm1448_vm5, %v1438_v52  ;;  %709 = vadd.xlane.f32.xlu1 %v708_v11  ;;  %v1116_v9 = vmul.f32 %v3233_v23, %v2299_v43  ;;  %v1125_v52 = vmul.f32 %v2788_v35, %v2382_v15 }
 0x3ca   : > { %v1368_v53 = vpop.permute.xlu0 %1367 }
 0x3cb   : > { %v1440_v54 = vsel %vm1431_vm4, %v1423_v12, %v1368_v53 }
 0x3cc   : > { %1457 = vst.msk [vmem:[%s2724_s8 + $0x40] sm:$0xff] %vm1448_vm5, %v1440_v54 }
 0x3ce   : > { %v1372_v17 = vpop.permute.xlu0 %1371 }
 0x3cf   : > { %v1442_v1 = vsel %vm1431_vm4, %v1425_v31, %v1372_v17 }
 0x3d0   : > { %1459 = vst.msk [vmem:[%s2724_s8 + $0x50] sm:$0xff] %vm1448_vm5, %v1442_v1 }
 0x3d2   : > { %v1248_v48 = vpop.permute.xlu0 %1247 }
 0x3d3   : > { %v2891_v0 = vpop.xlane.xlu1 %700 }
 0x3d6   : > { %v1312_v56 = vpop.permute.xlu0 %1311 }
 0x3d7   : > { %v1411_v55 = vsel %vm320_vm1, %v1248_v48, %v1312_v56  ;;  %v698_v37 = vpop.xlane.xlu1 %697  ;;  %v3234_v48 = vld [vmem:[#allocation16_spill] sm:$0xff] }
 0x3d8   : > { %v732_v36 = vadd.f32 1e-06, %v698_v37  ;;  %v1427_v50 = vsel %vm870_vm3, %v1411_v55, %v1123_v19 }
 0x3d9   : > { %1241 = vrot.lane.b32.xlu1 %v960_v2, %s2059_s30  ;;  %v675_v2 = vmul.f32 %v2730_v16, %v3235_v24 }
 0x3da   : > { %1894 = vrcp.f32 %v732_v36  ;;  %v1376_v44 = vpop.permute.xlu0 %1375 }
 0x3db   : > { %v1444_v13 = vsel %vm1431_vm4, %v1427_v50, %v1376_v44  ;;  %v1234_v21 = vpop.permute.xlu1 %1233  ;;  %v717_v55 = vsel %vm320_vm1, %v675_v2, 0.0  ;;  %v3242_v2 = vld [vmem:[#allocation26_spill] sm:$0xff] }
 0x3dc   : > { %1461 = vst.msk [vmem:[%s2724_s8 + $0x60] sm:$0xff] %vm1448_vm5, %v1444_v13 }
 0x3dd   : > { %1305 = vrot.lane.b32.xlu1 %v1040_v61, %s2056_s26 }
 0x3de   : > { %v1252_v4 = vpop.permute.xlu0 %1251 }
 0x3df   : > { %v1298_v51 = vpop.permute.xlu1 %1297 }
 0x3e0   : > { %v1404_v42 = vsel %vm320_vm1, %v1234_v21, %v1298_v51 }
 0x3e1   : > { %v1420_v12 = vsel %vm870_vm3, %v1404_v42, %v1116_v9  ;;  %v3238_v42 = vld [vmem:[#allocation22_spill] sm:$0xff]  ;;  %v3239_v9 = vld [vmem:[#allocation28_spill] sm:$0xff] }
 0x3e2   : > { %v1316_v46 = vpop.permute.xlu0 %1315 }
 0x3e3   : > { %v1413_v11 = vsel %vm320_vm1, %v1252_v4, %v1316_v46  ;;  %v1362_v26 = vpop.permute.xlu1 %1361  ;;  %v1200_v46 = vmul.f32 %v2659_v3, %v3231_v5  ;;  %v729_v3 = vadd.f32 1e-06, %v2801_v8 }
 0x3e4   : > { %v1895_v53 = vpop.eup %1894  ;;  %v1437_v14 = vsel %vm1431_vm4, %v1420_v12, %v1362_v26  ;;  %v2915_v54 = vsel %vm870_vm3, %v1413_v11, %v1125_v52  ;;  %v1198_v52 = vmul.f32 %v3239_v9, %v2345_v62  ;;  %v738_v26 = vadd.f32 1e-06, %v2860_v63  ;;  %v3240_v12 = vld [vmem:[#allocation14_spill] sm:$0xff] }
 0x3e5   : > { %v755_v57 = vmul.f32 %v1895_v53, %v698_v37  ;;  %1454 = vst.msk [vmem:[%s2724_s8 + $0x28] sm:$0xff] %vm1448_vm5, %v1437_v14  ;;  %v3237_v37 = vld [vmem:[#allocation27_spill] sm:$0xff] }
 0x3e6   : > { %v807_v35 = vpop.permute.xlu0 %806  ;;  %v3241_v53 = vld [vmem:[#allocation31_spill] sm:$0xff] }
 0x3e7   : > { %v780_v31 = vmul.f32 %v755_v57, %v2373_v10  ;;  %v854_v17 = vsel %vm320_vm1, %v807_v35, %v2291_v41  ;;  %v3236_v10 = vld [vmem:[#allocation12_spill] sm:$0xff]  ;;  %v964_v14 = vmul.f32 %v3241_v53, %v3240_v12 }
 0x3e8   : > { %871 = vst.msk [vmem:[%s2924_s10] sm:$0xff] %vm870_vm3, %v854_v17  ;;  %v962_v19 = vmul.f32 %v3237_v37, %v3236_v10  ;;  %v1042_v41 = vmul.f32 %v2689_v28, %v3236_v10  ;;  %v677_v28 = vmul.f32 %v2751_v30, %v3238_v42  ;;  %v727_v30 = vadd.f32 1e-06, %v2794_v7  ;;  %v3243_v37 = vld [vmem:[#allocation36_spill] sm:$0xff] }
 0x3e9   : > { %818 = vrot.lane.b32.xlu0 %v780_v31, %s2059_s30  ;;  %v1044_v31 = vmul.f32 %v2732_v33, %v3240_v12 }
 0x3ea   : > { %v815_v1 = vpop.permute.xlu0 %814  ;;  %v723_v23 = vsel %vm320_vm1, %v677_v28, 0.0 }
 0x3eb   : > { %v858_v56 = vsel %vm320_vm1, %v815_v1, %v3234_v48  ;;  %v728_v48 = vadd.f32 1e-06, %v2809_v18 }
 0x3ec   : > { %875 = vst.msk [vmem:[%s2924_s10 + $0x20] sm:$0xff] %vm870_vm3, %v858_v56 }
 0x401   : > { %718 = vadd.xlane.f32.xlu1 %v717_v55  ;;  %v1120_v55 = vmul.f32 %v3242_v2, %v3231_v5 }
 0x412   : > { %1245 = vrot.lane.b32.xlu1 %v962_v19, %s2059_s30  ;;  %v1204_v19 = vmul.f32 %v3243_v37, %v3240_v12 }
 0x414   : > { %v2944_v36 = vpop.xlane.xlu1 %706 }
 0x415   : > { %v735_v53 = vadd.f32 1e-06, %v2944_v36 }
 0x416   : > { %1309 = vrot.lane.b32.xlu1 %v1042_v41, %s2056_s26 }
 0x418   : > { %v704_v50 = vpop.xlane.xlu1 %703 }
 0x419   : > { %v734_v44 = vadd.f32 1e-06, %v704_v50 }
 0x41b   : > { %1896 = vrcp.f32 %v734_v44 }
 0x41c   : > { %v1238_v61 = vpop.permute.xlu1 %1237  ;;  %1898 = vrcp.f32 %v727_v30 }
 0x41d   : > { %1900 = vrcp.f32 %v738_v26 }
 0x420   : > { %v1302_v16 = vpop.permute.xlu1 %1301 }
 0x421   : > { %v2948_v13 = vsel %vm320_vm1, %v1238_v61, %v1302_v16  ;;  %v3244_v16 = vld [vmem:[#allocation17_spill] sm:$0xff] }
 0x425   : > { %v1897_v21 = vpop.eup %1896 }
 0x426   : > { %v759_v4 = vmul.f32 %v1897_v21, %v704_v50  ;;  %v1899_v44 = vpop.eup %1898  ;;  %v3245_v21 = vld [vmem:[#allocation33_spill] sm:$0xff] }
 0x427   : > { %v1901_v61 = vpop.eup %1900 }
 0x428   : > { %v782_v51 = vmul.f32 %v759_v4, %v2314_v49  ;;  %v1202_v49 = vmul.f32 %v2695_v47, %v3236_v10  ;;  %v740_v47 = vadd.f32 1e-06, %v2864_v40  ;;  %v966_v4 = vmul.f32 %v3245_v21, %v3244_v16 }
 0x42a   : > { %822 = vrot.lane.b32.xlu0 %v782_v51, %s2059_s30 }
 0x43a   : > { %724 = vadd.xlane.f32.xlu1 %v723_v23  ;;  %v733_v23 = vadd.f32 1e-06, %v2891_v0 }
 0x44b   : > { %1365 = vrot.lane.b32.xlu1 %v1198_v52, %s2060_s12  ;;  %v1046_v52 = vmul.f32 %v2758_v58, %v3244_v16 }
 0x44f   : > { %1369 = vrot.lane.b32.xlu1 %v1200_v46, %s2060_s12  ;;  %v745_v46 = vmul.f32 %v1899_v44, %v2794_v7 }
 0x451   : > { %v2963_v11 = vpop.xlane.xlu1 %712 }
 0x453   : > { %1373 = vrot.lane.b32.xlu1 %v1202_v49, %s2060_s12  ;;  %v767_v49 = vmul.f32 %v1901_v61, %v2860_v63 }
 0x455   : > { %v710_v57 = vpop.xlane.xlu1 %709  ;;  %v786_v58 = vmul.f32 %v767_v49, %v2360_v6  ;;  %v3246_v6 = vld [vmem:[#allocation35_spill] sm:$0xff] }
 0x456   : > { %v736_v35 = vadd.f32 1e-06, %v710_v57 }
 0x457   : > { %1249 = vrot.lane.b32.xlu1 %v964_v14, %s2059_s30  ;;  %v775_v14 = vmul.f32 %v745_v46, %v2267_v22 }
 0x458   : > { %1902 = vrcp.f32 %v736_v35 }
 0x459   : > { %v1242_v17 = vpop.permute.xlu1 %1241  ;;  %1904 = vrcp.f32 %v729_v3 }
 0x45a   : > { %1906 = vrcp.f32 %v740_v47 }
 0x45b   : > { %1313 = vrot.lane.b32.xlu1 %v1044_v31, %s2056_s26  ;;  %v819_v1 = vpop.permute.xlu0 %818  ;;  %1908 = vrcp.f32 %v728_v48 }
 0x45c   : > { %v860_v56 = vsel %vm320_vm1, %v819_v1, %v2409_v27  ;;  %v731_v27 = vadd.f32 1e-06, %v2845_v25 }
 0x45d   : > { %877 = vst.msk [vmem:[%s2924_s10 + $0x30] sm:$0xff] %vm870_vm3, %v860_v56  ;;  %v1306_v33 = vpop.permute.xlu1 %1305 }
 0x45e   : > { %v1408_v41 = vsel %vm320_vm1, %v1242_v17, %v1306_v33  ;;  %1910 = vrcp.f32 %v731_v27  ;;  %v3247_v27 = vld [vmem:[#allocation24_spill] sm:$0xff] }
 0x45f   : > { %1377 = vrot.lane.b32.xlu1 %v1204_v19, %s2060_s12  ;;  %v2988_v50 = vsel %vm870_vm3, %v1408_v41, %v1120_v55  ;;  %1912 = vrcp.f32 %v733_v23  ;;  %v1118_v61 = vmul.f32 %v3247_v27, %v2345_v62 }
 0x460   : > { %1914 = vrcp.f32 %v735_v53 }
 0x461   : > { %v1422_v21 = vsel %vm870_vm3, %v2948_v13, %v1118_v61 }
 0x462   : > { %v1903_v51 = vpop.eup %1902 }
 0x463   : > { %v763_v28 = vmul.f32 %v1903_v51, %v710_v57  ;;  %1253 = vrot.lane.b32.xlu1 %v966_v4, %s2059_s30  ;;  %v1905_v9 = vpop.eup %1904 }
 0x464   : > { %v1907_v26 = vpop.eup %1906  ;;  %v749_v57 = vmul.f32 %v1905_v9, %v2801_v8  ;;  %v1205_v8 = vmul.f32 %v3246_v6, %v2382_v15  ;;  %v3248_v9 = vld [vmem:[#allocation29_spill] sm:$0xff] }
 0x465   : > { %v784_v30 = vmul.f32 %v763_v28, %v2337_v59  ;;  %v771_v7 = vmul.f32 %v1907_v26, %v2864_v40  ;;  %v1909_v35 = vpop.eup %1908  ;;  %v737_v59 = vadd.f32 1e-06, %v2963_v11 }
 0x466   : > { %v777_v63 = vmul.f32 %v749_v57, %v2282_v34  ;;  %v747_v3 = vmul.f32 %v1909_v35, %v2809_v18  ;;  %v3250_v35 = vld [vmem:[#allocation32_spill] sm:$0xff] }
 0x467   : > { %1317 = vrot.lane.b32.xlu1 %v1046_v52, %s2056_s26  ;;  %826 = vrot.lane.b32.xlu0 %v784_v30, %s2059_s30  ;;  %v788_v22 = vmul.f32 %v771_v7, %v2382_v15  ;;  %1916 = vrcp.f32 %v737_v59  ;;  %v1124_v59 = vmul.f32 %v3250_v35, %v3240_v12 }
 0x468   : > { %v1911_v47 = vpop.eup %1910  ;;  %v776_v40 = vmul.f32 %v747_v3, %v2306_v45  ;;  %v3251_v3 = vld [vmem:[#allocation21_spill] sm:$0xff] }
 0x469   : > { %v753_v31 = vmul.f32 %v1911_v47, %v2845_v25  ;;  %v1913_v17 = vpop.eup %1912 }
 0x46a   : > { %v757_v18 = vmul.f32 %v1913_v17, %v2891_v0  ;;  %v1915_v1 = vpop.eup %1914 }
 0x46b   : > { %808 = vrot.lane.b32.xlu1 %v775_v14, %s2059_s30  ;;  %830 = vrot.lane.b32.xlu0 %v786_v58, %s2059_s30  ;;  %v779_v34 = vmul.f32 %v753_v31, %v2299_v43  ;;  %v761_v15 = vmul.f32 %v1915_v1, %v2944_v36  ;;  %v3249_v14 = vld [vmem:[#allocation37_spill] sm:$0xff] }
 0x46c   : > { %v781_v48 = vmul.f32 %v757_v18, %v2345_v62  ;;  %v1122_v62 = vmul.f32 %v3248_v9, %v3236_v10  ;;  %v1206_v57 = vmul.f32 %v3249_v14, %v3244_v16 }
 0x46d   : > { %v783_v25 = vmul.f32 %v761_v15, %v3231_v5 }
 0x46f   : > { %812 = vrot.lane.b32.xlu1 %v777_v63, %s2059_s30  ;;  %834 = vrot.lane.b32.xlu0 %v788_v22, %s2059_s30 }
 0x471   : > { %v1917_v45 = vpop.eup %1916 }
 0x472   : > { %v765_v56 = vmul.f32 %v1917_v45, %v2963_v11  ;;  %v3253_v45 = vld [vmem:[#allocation9_spill] sm:$0xff] }
 0x473   : > { %810 = vrot.lane.b32.xlu1 %v776_v40, %s2059_s30  ;;  %1379 = vrot.lane.b32.xlu0 %v1205_v8, %s2060_s12 }
 0x474   : > { %v785_v43 = vmul.f32 %v765_v56, %v3236_v10  ;;  %v3254_v56 = vld [vmem:[#allocation11_spill] sm:$0xff] }
 0x477   : > { %816 = vrot.lane.b32.xlu1 %v779_v34, %s2059_s30  ;;  %v3252_v34 = vld [vmem:[#allocation34_spill] sm:$0xff] }
 0x478   : > { %v1126_v18 = vmul.f32 %v3252_v34, %v3244_v16 }
 0x47b   : > { %820 = vrot.lane.b32.xlu1 %v781_v48, %s2059_s30 }
 0x47f   : > { %824 = vrot.lane.b32.xlu1 %v783_v25, %s2059_s30 }
 0x483   : > { %828 = vrot.lane.b32.xlu1 %v785_v43, %s2059_s30 }
 0x48e   : > { %v719_v0 = vpop.xlane.xlu1 %718 }
 0x48f   : > { %v739_v2 = vadd.f32 1e-06, %v719_v0 }
 0x491   : > { %1918 = vrcp.f32 %v739_v2 }
 0x492   : > { %v1246_v11 = vpop.permute.xlu1 %1245 }
 0x496   : > { %v1310_v33 = vpop.permute.xlu1 %1309 }
 0x497   : > { %v1410_v28 = vsel %vm320_vm1, %v1246_v11, %v1310_v33 }
 0x498   : > { %v1426_v13 = vsel %vm870_vm3, %v1410_v28, %v1122_v62 }
 0x49b   : > { %v1919_v55 = vpop.eup %1918 }
 0x49c   : > { %v769_v36 = vmul.f32 %v1919_v55, %v719_v0  ;;  %v823_v37 = vpop.permute.xlu0 %822  ;;  %v3255_v0 = vld [vmem:[#allocation15_spill] sm:$0xff] }
 0x49d   : > { %v862_v19 = vsel %vm320_vm1, %v823_v37, %v2435_v38 }
 0x49e   : > { %v787_v5 = vmul.f32 %v769_v36, %v3240_v12  ;;  %879 = vst.msk [vmem:[%s2924_s10 + $0x40] sm:$0xff] %vm870_vm3, %v862_v19  ;;  %v3256_v36 = vld [vmem:[#allocation13_spill] sm:$0xff] }
 0x4a0   : > { %832 = vrot.lane.b32.xlu1 %v787_v5, %s2059_s30 }
 0x4c7   : > { %v725_v41 = vpop.xlane.xlu1 %724 }
 0x4c8   : > { %v741_v44 = vadd.f32 1e-06, %v725_v41 }
 0x4ca   : > { %1920 = vrcp.f32 %v741_v44 }
 0x4cb   : > { %v1366_v38 = vpop.permute.xlu1 %1365 }
 0x4cc   : > { %v1439_v4 = vsel %vm1431_vm4, %v1422_v21, %v1366_v38 }
 0x4cd   : > { %1456 = vst.msk [vmem:[%s2724_s8 + $0x38] sm:$0xff] %vm1448_vm5, %v1439_v4 }
 0x4cf   : > { %v1370_v51 = vpop.permute.xlu1 %1369 }
 0x4d0   : > { %v1441_v23 = vsel %vm1431_vm4, %v2988_v50, %v1370_v51 }
 0x4d1   : > { %1458 = vst.msk [vmem:[%s2724_s8 + $0x48] sm:$0xff] %vm1448_vm5, %v1441_v23 }
 0x4d3   : > { %v1374_v52 = vpop.permute.xlu1 %1373 }
 0x4d4   : > { %v1921_v46 = vpop.eup %1920  ;;  %v1443_v49 = vsel %vm1431_vm4, %v1426_v13, %v1374_v52 }
 0x4d5   : > { %v773_v30 = vmul.f32 %v1921_v46, %v725_v41  ;;  %1460 = vst.msk [vmem:[%s2724_s8 + $0x58] sm:$0xff] %vm1448_vm5, %v1443_v49 }
 0x4d7   : > { %v789_v26 = vmul.f32 %v773_v30, %v3244_v16  ;;  %v1250_v53 = vpop.permute.xlu1 %1249 }
 0x4d9   : > { %836 = vrot.lane.b32.xlu1 %v789_v26, %s2059_s30  ;;  %v827_v50 = vpop.permute.xlu0 %826 }
 0x4da   : > { %v864_v10 = vsel %vm320_vm1, %v827_v50, %v3229_v60 }
 0x4db   : > { %881 = vst.msk [vmem:[%s2924_s10 + $0x50] sm:$0xff] %vm870_vm3, %v864_v10  ;;  %v1314_v58 = vpop.permute.xlu1 %1313 }
 0x4dc   : > { %v1412_v7 = vsel %vm320_vm1, %v1250_v53, %v1314_v58 }
 0x4dd   : > { %1381 = vrot.lane.b32.xlu1 %v1206_v57, %s2060_s12  ;;  %v831_v63 = vpop.permute.xlu0 %830  ;;  %v1428_v47 = vsel %vm870_vm3, %v1412_v7, %v1124_v59 }
 0x4de   : > { %v866_v22 = vsel %vm320_vm1, %v831_v63, %v3251_v3 }
 0x4df   : > { %883 = vst.msk [vmem:[%s2924_s10 + $0x60] sm:$0xff] %vm870_vm3, %v866_v22  ;;  %v1378_v60 = vpop.permute.xlu1 %1377 }
 0x4e0   : > { %v1445_v6 = vsel %vm1431_vm4, %v1428_v47, %v1378_v60 }
 0x4e1   : > { %1462 = vst.msk [vmem:[%s2724_s8 + $0x68] sm:$0xff] %vm1448_vm5, %v1445_v6  ;;  %v835_v8 = vpop.permute.xlu0 %834 }
 0x4e2   : > { %v868_v12 = vsel %vm320_vm1, %v835_v8, %v2528_v29 }
 0x4e3   : > { %885 = vst.msk [vmem:[%s2924_s10 + $0x70] sm:$0xff] %vm870_vm3, %v868_v12  ;;  %v1254_v40 = vpop.permute.xlu1 %1253 }
 0x4e5   : > { %v1380_v31 = vpop.permute.xlu0 %1379 }
 0x4e6   : > { %v1446_v17 = vsel %vm1431_vm4, %v2915_v54, %v1380_v31 }
 0x4e7   : > { %1463 = vst.msk [vmem:[%s2724_s8 + $0x70] sm:$0xff] %vm1448_vm5, %v1446_v17  ;;  %v1318_v1 = vpop.permute.xlu1 %1317 }
 0x4e8   : > { %v1414_v48 = vsel %vm320_vm1, %v1254_v40, %v1318_v1 }
 0x4e9   : > { %v1430_v29 = vsel %vm870_vm3, %v1414_v48, %v1126_v18 }
 0x4eb   : > { %v809_v15 = vpop.permute.xlu1 %808 }
 0x4ec   : > { %v855_v25 = vsel %vm320_vm1, %v809_v15, %v3253_v45 }
 0x4ed   : > { %872 = vst.msk [vmem:[%s2924_s10 + $0x8] sm:$0xff] %vm870_vm3, %v855_v25 }
 0x4ef   : > { %v813_v54 = vpop.permute.xlu1 %812 }
 0x4f0   : > { %v857_v16 = vsel %vm320_vm1, %v813_v54, %v3254_v56 }
 0x4f1   : > { %874 = vst.msk [vmem:[%s2924_s10 + $0x18] sm:$0xff] %vm870_vm3, %v857_v16 }
 0x4f3   : > { %v811_v43 = vpop.permute.xlu1 %810 }
 0x4f4   : > { %v856_v2 = vsel %vm320_vm1, %v811_v43, %v3255_v0 }
 0x4f5   : > { %873 = vst.msk [vmem:[%s2924_s10 + $0x10] sm:$0xff] %vm870_vm3, %v856_v2 }
 0x4f7   : > { %v817_v55 = vpop.permute.xlu1 %816 }
 0x4f8   : > { %v859_v37 = vsel %vm320_vm1, %v817_v55, %v3256_v36 }
 0x4f9   : > { %876 = vst.msk [vmem:[%s2924_s10 + $0x28] sm:$0xff] %vm870_vm3, %v859_v37 }
 0x4fb   : > { %v821_v19 = vpop.permute.xlu1 %820 }
 0x4fc   : > { %v861_v5 = vsel %vm320_vm1, %v821_v19, %v2395_v20 }
 0x4fd   : > { %878 = vst.msk [vmem:[%s2924_s10 + $0x38] sm:$0xff] %vm870_vm3, %v861_v5 }
 0x4ff   : > { %v825_v11 = vpop.permute.xlu1 %824 }
 0x500   : > { %v863_v33 = vsel %vm320_vm1, %v825_v11, %v2421_v32 }
 0x501   : > { %880 = vst.msk [vmem:[%s2924_s10 + $0x48] sm:$0xff] %vm870_vm3, %v863_v33 }
 0x503   : > { %v829_v41 = vpop.permute.xlu1 %828 }
 0x504   : > { %v865_v44 = vsel %vm320_vm1, %v829_v41, %v3228_v39 }
 0x505   : > { %882 = vst.msk [vmem:[%s2924_s10 + $0x58] sm:$0xff] %vm870_vm3, %v865_v44 }
 0x512   : > { %v833_v27 = vpop.permute.xlu1 %832 }
 0x513   : > { %v867_v61 = vsel %vm320_vm1, %v833_v27, %v3235_v24 }
 0x514   : > { %884 = vst.msk [vmem:[%s2924_s10 + $0x68] sm:$0xff] %vm870_vm3, %v867_v61 }
 0x54b   : > { %v837_v20 = vpop.permute.xlu1 %836 }
 0x54c   : > { %v869_v21 = vsel %vm320_vm1, %v837_v20, %v3238_v42 }
 0x54d   : > { %886 = vst.msk [vmem:[%s2924_s10 + $0x78] sm:$0xff] %vm870_vm3, %v869_v21 }
 0x54f   : > { %v1382_v32 = vpop.permute.xlu1 %1381 }
 0x550   : > { %v1447_v38 = vsel %vm1431_vm4, %v1430_v29, %v1382_v32 }
 0x551   : > { %1464 = vst.msk [vmem:[%s2724_s8 + $0x78] sm:$0xff] %vm1448_vm5, %v1447_v38 }
 0x552 PF: > { %s19_s22 = sadd.s32 1, %s2050_s22   ;;  %s3257_s11 = sld [smem:[#allocation8_spill]] }
 0x553   : > { %p16_p4 = scmp.ge.s32.totalorder %s19_s22, 6   ;;  %s3258_s14 = smov %s3271_s15 }
 0x554   : > { %s3259_s15 = smov %s2026_s16  ;;  %s3260_s16 = smov %s2030_s17 }
 0x555   : > { %s3261_s17 = smov %s2190_s13  ;;  %s3262_s18 = smov %s2042_s20 }
 0x556   : > { %s3263_s19 = smov %s2046_s21  ;;  %s3265_s21 = smov %s3258_s14 }
 0x557   :  { %18 = sbr.rel (!%p16_p4) target bundleno = 8 (0x8), region = 88 }
 0x558   : > { %s3264_s20 = smov %s3257_s11 }
 0x55e   :  { %1520 = vsyncpa [#allocation3], 1 }
 0x55f   :  { %1522 = vsyncpa [#allocation3 + $0x1], 1 }
 0x560   :  { %1523 = vsyncpa [#allocation5], 1 }

</bundles_post_ra>
